<compile_context>
chip_gen: v5e
topology: v5e:2x2
jax: 0.10.0
libtpu: 0.0.40
codegen_flags: <defaults>
</compile_context>

<pallas_src>
import jax
import jax.numpy as jnp
import numpy as np
from jax.experimental import pallas as pl
from jax.experimental.pallas import tpu as pltpu

# ----- synthetic CLIP-text hyperparameters (small) --------------------------
B = 2        # number of prompts (batch)
S = 8        # context length (seq)
D = 32       # transformer width
H = 4        # attention heads
DH = D // H  # head dim
FFN = 4 * D  # MLP hidden
P = 32       # text projection output dim
LAYERS = 2   # transformer depth
EPS = 1e-5
NEG_INF = -1e9


def _ln(x, w, b):
    mu = jnp.mean(x, axis=-1, keepdims=True)
    var = jnp.mean((x - mu) ** 2, axis=-1, keepdims=True)
    return (x - mu) * jax.lax.rsqrt(var + EPS) * w + b


# ------------------------------ fused kernel --------------------------------
def text_encoder_kernel(eot_ref,                                   # SMEM (B,)
                        prompts_ref, pos_ref,
                        ln1_w_ref, ln1_b_ref, wqkv_ref, bqkv_ref, wo_ref, bo_ref,
                        ln2_w_ref, ln2_b_ref, w1_ref, b1_ref, w2_ref, b2_ref,
                        lnf_w_ref, lnf_b_ref, proj_ref,
                        out_ref,
                        x_ref):                                    # VMEM scratch (B,S,D) f32
    l = pl.program_id(0)

    # ---- fused "x = prompts + positional_embedding" (first layer step only) ----
    @pl.when(l == 0)
    def _():
        x_ref[...] = prompts_ref[...] + pos_ref[...][None, :, :]

    x = x_ref[...]                                     # (B, S, D) f32, resident

    # ----------------- causal multi-head self-attention -----------------
    h = _ln(x, ln1_w_ref[0, 0], ln1_b_ref[0, 0])
    h_bf = h.reshape(B * S, D).astype(jnp.bfloat16)    # bf16 MXU operand

    scale = 1.0 / (DH ** 0.5)
    q_heads, k_heads, v_heads = [], [], []
    for hh in range(H):                                # static, fully unrolled
        qh = jnp.dot(h_bf, wqkv_ref[0, 0, hh],
                     preferred_element_type=jnp.float32) + bqkv_ref[0, 0, hh]
        kh = jnp.dot(h_bf, wqkv_ref[0, 1, hh],
                     preferred_element_type=jnp.float32) + bqkv_ref[0, 1, hh]
        vh = jnp.dot(h_bf, wqkv_ref[0, 2, hh],
                     preferred_element_type=jnp.float32) + bqkv_ref[0, 2, hh]
        q_heads.append((qh * scale).reshape(B, S, DH))
        k_heads.append(kh.reshape(B, S, DH))
        v_heads.append(vh.reshape(B, S, DH))
    # Fold heads into the single batch dim: (H*B, S, DH).
    # (Mosaic dot_general supports one batch dim, so a 4-D 'bqhd,bkhd->bhqk'
    #  contraction is not lowerable; this gives the same head-batched matmuls.)
    q = jnp.concatenate(q_heads, axis=0).astype(jnp.bfloat16)
    k = jnp.concatenate(k_heads, axis=0).astype(jnp.bfloat16)
    v = jnp.concatenate(v_heads, axis=0).astype(jnp.bfloat16)

    # head-batched scores + in-kernel causal mask (no (S,S) mask input)
    s = jnp.einsum('nqd,nkd->nqk', q, k, preferred_element_type=jnp.float32)
    row = jax.lax.broadcasted_iota(jnp.int32, (S, S), 0)
    col = jax.lax.broadcasted_iota(jnp.int32, (S, S), 1)
    causal = jnp.where(row >= col, jnp.float32(0.0), jnp.float32(NEG_INF))
    s = s + causal[None, :, :]

    # softmax in f32; divide -> EUP approximate reciprocal
    s = s - jnp.max(s, axis=-1, keepdims=True)
    p = jnp.exp(s)
    p = p * pl.reciprocal(jnp.sum(p, axis=-1, keepdims=True), approx=True)

    o = jnp.einsum('nqk,nkd->nqd', p.astype(jnp.bfloat16), v,
                   preferred_element_type=jnp.float32)            # (H*B, S, DH)

    # output projection: sum_h O_h @ Wo_h  (no lane-axis concat of heads)
    attn = None
    for hh in range(H):
        oh = o[hh * B:(hh + 1) * B].reshape(B * S, DH).astype(jnp.bfloat16)
        part = jnp.dot(oh, wo_ref[0, hh], preferred_element_type=jnp.float32)
        attn = part if attn is None else attn + part
    attn = attn + bo_ref[0, 0]
    x = x + attn.reshape(B, S, D)

    # ----------------------------- MLP (QuickGELU) -----------------------------
    h2 = _ln(x, ln2_w_ref[0, 0], ln2_b_ref[0, 0]).reshape(B * S, D)
    h2 = h2.astype(jnp.bfloat16)
    m = jnp.dot(h2, w1_ref[0], preferred_element_type=jnp.float32) + b1_ref[0, 0]
    m = m * jax.nn.sigmoid(1.702 * m)                  # QuickGELU (f32, EUP)
    m = jnp.dot(m.astype(jnp.bfloat16), w2_ref[0],
                preferred_element_type=jnp.float32) + b2_ref[0, 0]
    x = x + m.reshape(B, S, D)

    x_ref[...] = x                                     # carry to next layer step

    # -------- epilogue: ln_final -> EOT gather (pl.ds) -> text_projection --------
    @pl.when(l == pl.num_programs(0) - 1)
    def _():
        rows = [x_ref[pl.ds(b, 1), pl.ds(eot_ref[b], 1), :].reshape(1, D)
                for b in range(B)]                     # dynamic per-row gather
        x_eot = jnp.concatenate(rows, axis=0)          # (B, D) f32
        x_eot = _ln(x_eot, lnf_w_ref[0], lnf_b_ref[0])  # LN commutes with gather
        out_ref[...] = jnp.dot(x_eot.astype(jnp.bfloat16), proj_ref[...],
                               preferred_element_type=jnp.float32)


# ----------------------------- parameter setup ------------------------------
def init_params(key):
    ks = jax.random.split(key, 4 + LAYERS)
    scale = 0.02
    params = {
        "pos": scale * jax.random.normal(ks[0], (S, D), jnp.float32),
        "lnf_w": jnp.ones((D,), jnp.float32),
        "lnf_b": jnp.zeros((D,), jnp.float32),
        "text_projection": scale * jax.random.normal(ks[1], (D, P), jnp.float32),
        "layers": [],
    }
    for i in range(LAYERS):
        lk = jax.random.split(ks[4 + i], 4)
        params["layers"].append({
            "ln1_w": jnp.ones((D,), jnp.float32),
            "ln1_b": jnp.zeros((D,), jnp.float32),
            "wqkv": scale * jax.random.normal(lk[0], (D, 3 * D), jnp.float32),
            "bqkv": jnp.zeros((3 * D,), jnp.float32),
            "wo": scale * jax.random.normal(lk[1], (D, D), jnp.float32),
            "bo": jnp.zeros((D,), jnp.float32),
            "ln2_w": jnp.ones((D,), jnp.float32),
            "ln2_b": jnp.zeros((D,), jnp.float32),
            "w1": scale * jax.random.normal(lk[2], (D, FFN), jnp.float32),
            "b1": jnp.zeros((FFN,), jnp.float32),
            "w2": scale * jax.random.normal(lk[3], (FFN, D), jnp.float32),
            "b2": jnp.zeros((D,), jnp.float32),
        })
    return params


def _pack_params(params):
    """Stack per-layer weights with a leading layer axis (trace-time, free).
    Matmul weights are cast to bf16 (MXU operands); LN/bias stay f32."""
    Ls = params["layers"]

    def stack(fn, dtype=None):
        a = jnp.stack([fn(L) for L in Ls], axis=0)
        return a.astype(dtype) if dtype is not None else a

    return dict(
        pos=params["pos"],                                                   # (S, D) f32
        ln1_w=stack(lambda L: L["ln1_w"][None, :]),                          # (L, 1, D)
        ln1_b=stack(lambda L: L["ln1_b"][None, :]),
        # (D, 3D) -> (3, H, D, DH): per-head q/k/v weight tiles (trace-time split)
        wqkv=stack(lambda L: L["wqkv"].reshape(D, 3, H, DH).transpose(1, 2, 0, 3),
                   jnp.bfloat16),                                            # (L, 3, H, D, DH)
        bqkv=stack(lambda L: L["bqkv"].reshape(3, H, DH)),                   # (L, 3, H, DH)
        wo=stack(lambda L: L["wo"].reshape(H, DH, D), jnp.bfloat16),         # (L, H, DH, D)
        bo=stack(lambda L: L["bo"][None, :]),                                # (L, 1, D)
        ln2_w=stack(lambda L: L["ln2_w"][None, :]),
        ln2_b=stack(lambda L: L["ln2_b"][None, :]),
        w1=stack(lambda L: L["w1"], jnp.bfloat16),                           # (L, D, FFN)
        b1=stack(lambda L: L["b1"][None, :]),                                # (L, 1, FFN)
        w2=stack(lambda L: L["w2"], jnp.bfloat16),                           # (L, FFN, D)
        b2=stack(lambda L: L["b2"][None, :]),                                # (L, 1, D)
        lnf_w=params["lnf_w"][None, :],                                      # (1, D)
        lnf_b=params["lnf_b"][None, :],
        proj=params["text_projection"].astype(jnp.bfloat16),                 # (D, P)
    )


# ------------------------------- forward ------------------------------------
def text_encoder_forward(prompts, tokenized_prompts, params):
    pk = _pack_params(params)
    eot = jnp.argmax(tokenized_prompts, axis=-1).astype(jnp.int32)   # (B,) scalar prefetch

    grid_spec = pltpu.PrefetchScalarGridSpec(
        num_scalar_prefetch=1,
        grid=(LAYERS,),
        in_specs=[
            pl.BlockSpec((B, S, D), lambda l, e: (0, 0, 0)),               # prompts
            pl.BlockSpec((S, D), lambda l, e: (0, 0)),                     # pos
            pl.BlockSpec((1, 1, D), lambda l, e: (l, 0, 0)),               # ln1_w
            pl.BlockSpec((1, 1, D), lambda l, e: (l, 0, 0)),               # ln1_b
            pl.BlockSpec((1, 3, H, D, DH), lambda l, e: (l, 0, 0, 0, 0)),  # wqkv (bf16)
            pl.BlockSpec((1, 3, H, DH), lambda l, e: (l, 0, 0, 0)),        # bqkv
            pl.BlockSpec((1, H, DH, D), lambda l, e: (l, 0, 0, 0)),        # wo (bf16)
            pl.BlockSpec((1, 1, D), lambda l, e: (l, 0, 0)),               # bo
            pl.BlockSpec((1, 1, D), lambda l, e: (l, 0, 0)),               # ln2_w
            pl.BlockSpec((1, 1, D), lambda l, e: (l, 0, 0)),               # ln2_b
            pl.BlockSpec((1, D, FFN), lambda l, e: (l, 0, 0)),             # w1 (bf16)
            pl.BlockSpec((1, 1, FFN), lambda l, e: (l, 0, 0)),             # b1
            pl.BlockSpec((1, FFN, D), lambda l, e: (l, 0, 0)),             # w2 (bf16)
            pl.BlockSpec((1, 1, D), lambda l, e: (l, 0, 0)),               # b2
            pl.BlockSpec((1, D), lambda l, e: (0, 0)),                     # lnf_w
            pl.BlockSpec((1, D), lambda l, e: (0, 0)),                     # lnf_b
            pl.BlockSpec((D, P), lambda l, e: (0, 0)),                     # proj (bf16)
        ],
        out_specs=pl.BlockSpec((B, P), lambda l, e: (0, 0)),
        scratch_shapes=[pltpu.VMEM((B, S, D), jnp.float32)],               # resident x
    )

    # TODO(synk): at real CLIP sizes add a leading 'parallel' batch grid axis
    # (v7x 2-TC occupancy) and keep per-layer weight streaming 2-deep buffered
    # so the working set stays under v7x's 64 MiB VMEM.
    return pl.pallas_call(
        text_encoder_kernel,
        out_shape=jax.ShapeDtypeStruct((B, P), jnp.float32),
        grid_spec=grid_spec,
        compiler_params=pltpu.CompilerParams(
            dimension_semantics=("arbitrary",),      # layer axis carries state
            vmem_limit_bytes=64 * 1024 * 1024,
        ),
    )(eot, prompts, pk["pos"], pk["ln1_w"], pk["ln1_b"], pk["wqkv"], pk["bqkv"],
      pk["wo"], pk["bo"], pk["ln2_w"], pk["ln2_b"], pk["w1"], pk["b1"],
      pk["w2"], pk["b2"], pk["lnf_w"], pk["lnf_b"], pk["proj"])


# --------------------------- pure-JAX reference ------------------------------
def reference_forward(prompts, tokenized_prompts, params):
    x = prompts + params["pos"][None]
    mask = jnp.triu(jnp.full((S, S), NEG_INF, jnp.float32), k=1)
    for L in params["layers"]:
        h = _ln(x, L["ln1_w"], L["ln1_b"])
        qkv = h @ L["wqkv"] + L["bqkv"]
        q, k, v = jnp.split(qkv, 3, axis=-1)
        q = q.reshape(B, S, H, DH).transpose(0, 2, 1, 3) / (DH ** 0.5)
        k = k.reshape(B, S, H, DH).transpose(0, 2, 1, 3)
        v = v.reshape(B, S, H, DH).transpose(0, 2, 1, 3)
        s = jnp.einsum("bhqd,bhkd->bhqk", q, k) + mask
        p = jax.nn.softmax(s, axis=-1)
        a = jnp.einsum("bhqk,bhkd->bhqd", p, v).transpose(0, 2, 1, 3).reshape(B, S, D)
        x = x + (a @ L["wo"] + L["bo"])
        h2 = _ln(x, L["ln2_w"], L["ln2_b"])
        m = h2 @ L["w1"] + L["b1"]
        m = m * jax.nn.sigmoid(1.702 * m)
        x = x + (m @ L["w2"] + L["b2"])
    x = _ln(x, params["lnf_w"], params["lnf_b"])
    eot = jnp.argmax(tokenized_prompts, axis=-1)
    return x[jnp.arange(B), eot] @ params["text_projection"]


if __name__ == "__main__":
    key = jax.random.PRNGKey(0)
    k_prompts, k_tok, k_params = jax.random.split(key, 3)

    prompts = jax.random.normal(k_prompts, (B, S, D), jnp.float32)
    tokenized_prompts = jax.random.randint(k_tok, (B, S), 1, 100, jnp.int32)
    # place a large "EOT" token id so argmax picks a definite position
    eot_pos = jnp.array([5, 7], jnp.int32)
    tokenized_prompts = tokenized_prompts.at[jnp.arange(B), eot_pos].set(49407)

    params = init_params(k_params)

    out = text_encoder_forward(prompts, tokenized_prompts, params)
    out = jax.block_until_ready(out)

    ref = jax.block_until_ready(
        reference_forward(prompts, tokenized_prompts, params))
    # Tolerance accounts for bf16 MXU operands + approx reciprocal in softmax
    # (the f32 reference is kept exact).
    np.testing.assert_allclose(np.asarray(out), np.asarray(ref),
                               rtol=2e-2, atol=2e-2)

    assert out.shape == (B, P) and out.dtype == jnp.float32
    print("KERNEL_OK")
</pallas_src>

<mosaic_0001>
module attributes {stable_mosaic.version = 11 : i64} {
  func.func @text_encoder_kernel(%arg0: i32, %arg1: memref<2xi32, #tpu.memory_space<smem>>, %arg2: memref<2x8x32xf32, #tpu.memory_space<vmem>>, %arg3: memref<8x32xf32, #tpu.memory_space<vmem>>, %arg4: memref<1x1x32xf32, #tpu.memory_space<vmem>>, %arg5: memref<1x1x32xf32, #tpu.memory_space<vmem>>, %arg6: memref<1x3x4x32x8xbf16, #tpu.memory_space<vmem>>, %arg7: memref<1x3x4x8xf32, #tpu.memory_space<vmem>>, %arg8: memref<1x4x8x32xbf16, #tpu.memory_space<vmem>>, %arg9: memref<1x1x32xf32, #tpu.memory_space<vmem>>, %arg10: memref<1x1x32xf32, #tpu.memory_space<vmem>>, %arg11: memref<1x1x32xf32, #tpu.memory_space<vmem>>, %arg12: memref<1x32x128xbf16, #tpu.memory_space<vmem>>, %arg13: memref<1x1x128xf32, #tpu.memory_space<vmem>>, %arg14: memref<1x128x32xbf16, #tpu.memory_space<vmem>>, %arg15: memref<1x1x32xf32, #tpu.memory_space<vmem>>, %arg16: memref<1x32xf32, #tpu.memory_space<vmem>>, %arg17: memref<1x32xf32, #tpu.memory_space<vmem>>, %arg18: memref<32x32xbf16, #tpu.memory_space<vmem>>, %arg19: memref<2x32xf32, #tpu.memory_space<vmem>>, %arg20: memref<2x8x32xf32, #tpu.memory_space<vmem>>) attributes {dimension_semantics = [#tpu.dimension_semantics<arbitrary>], iteration_bounds = array<i64: 2>, scalar_prefetch = 1 : i64, scratch_operands = 1 : i64, tpu.core_type = #tpu.core_type<tc>, window_params = [{pipeline_mode = #tpu.pipeline_mode<synchronous>, transform_indices = @transform_0, window_bounds = array<i64: 2, 8, 32>}, {pipeline_mode = #tpu.pipeline_mode<synchronous>, transform_indices = @transform_1, window_bounds = array<i64: 8, 32>}, {transform_indices = @transform_2, window_bounds = array<i64: 1, 1, 32>}, {transform_indices = @transform_3, window_bounds = array<i64: 1, 1, 32>}, {transform_indices = @transform_4, window_bounds = array<i64: 1, 3, 4, 32, 8>}, {transform_indices = @transform_5, window_bounds = array<i64: 1, 3, 4, 8>}, {transform_indices = @transform_6, window_bounds = array<i64: 1, 4, 8, 32>}, {transform_indices = @transform_7, window_bounds = array<i64: 1, 1, 32>}, {transform_indices = @transform_8, window_bounds = array<i64: 1, 1, 32>}, {transform_indices = @transform_9, window_bounds = array<i64: 1, 1, 32>}, {transform_indices = @transform_10, window_bounds = array<i64: 1, 32, 128>}, {transform_indices = @transform_11, window_bounds = array<i64: 1, 1, 128>}, {transform_indices = @transform_12, window_bounds = array<i64: 1, 128, 32>}, {transform_indices = @transform_13, window_bounds = array<i64: 1, 1, 32>}, {pipeline_mode = #tpu.pipeline_mode<synchronous>, transform_indices = @transform_14, window_bounds = array<i64: 1, 32>}, {pipeline_mode = #tpu.pipeline_mode<synchronous>, transform_indices = @transform_15, window_bounds = array<i64: 1, 32>}, {pipeline_mode = #tpu.pipeline_mode<synchronous>, transform_indices = @transform_16, window_bounds = array<i64: 32, 32>}, {pipeline_mode = #tpu.pipeline_mode<synchronous>, transform_indices = @transform_17, window_bounds = array<i64: 2, 32>}]} {
    %c0_i32 = arith.constant 0 : i32
    %0 = arith.cmpi eq, %arg0, %c0_i32 : i32
    %1 = arith.extui %0 : i1 to i32
    %c0_i32_0 = arith.constant 0 : i32
    %2 = arith.cmpi ne, %1, %c0_i32_0 : i32
    scf.if %2 {
      %c0_194 = arith.constant 0 : index
      %c0_195 = arith.constant 0 : index
      %c0_196 = arith.constant 0 : index
      %273 = vector.load %arg2[%c0_194, %c0_195, %c0_196] : memref<2x8x32xf32, #tpu.memory_space<vmem>>, vector<2x8x32xf32>
      %c0_197 = arith.constant 0 : index
      %c0_198 = arith.constant 0 : index
      %274 = vector.load %arg3[%c0_197, %c0_198] : memref<8x32xf32, #tpu.memory_space<vmem>>, vector<8x32xf32>
      %275 = vector.shape_cast %274 : vector<8x32xf32> to vector<1x8x32xf32>
      %276 = vector.broadcast %275 : vector<1x8x32xf32> to vector<2x8x32xf32>
      %277 = arith.addf %273, %276 : vector<2x8x32xf32>
      %c0_199 = arith.constant 0 : index
      %c0_200 = arith.constant 0 : index
      %c0_201 = arith.constant 0 : index
      %278 = vector.load %arg20[%c0_199, %c0_200, %c0_201] : memref<2x8x32xf32, #tpu.memory_space<vmem>>, vector<2x8x32xf32>
      tpu.vector_store %arg20[%c0_199, %c0_200, %c0_201], %277 {strides = array<i32>} : memref<2x8x32xf32, #tpu.memory_space<vmem>>, vector<2x8x32xf32>,
    } else {
    }
    %c0 = arith.constant 0 : index
    %c0_1 = arith.constant 0 : index
    %c0_2 = arith.constant 0 : index
    %3 = vector.load %arg20[%c0, %c0_1, %c0_2] : memref<2x8x32xf32, #tpu.memory_space<vmem>>, vector<2x8x32xf32>
    %c0_3 = arith.constant 0 : index
    %c0_4 = arith.constant 0 : index
    %c0_5 = arith.constant 0 : index
    %4 = vector.load %arg4[%c0_3, %c0_4, %c0_5] : memref<1x1x32xf32, #tpu.memory_space<vmem>>, vector<1x1x32xf32>
    %5 = vector.shape_cast %4 : vector<1x1x32xf32> to vector<32xf32>
    %c0_6 = arith.constant 0 : index
    %c0_7 = arith.constant 0 : index
    %c0_8 = arith.constant 0 : index
    %6 = vector.load %arg5[%c0_6, %c0_7, %c0_8] : memref<1x1x32xf32, #tpu.memory_space<vmem>>, vector<1x1x32xf32>
    %7 = vector.shape_cast %6 : vector<1x1x32xf32> to vector<32xf32>
    %cst = arith.constant dense<0.000000e+00> : vector<2x8xf32>
    %8 = vector.multi_reduction <add>, %3, %cst [2] : vector<2x8x32xf32> to vector<2x8xf32>
    %9 = vector.shape_cast %8 : vector<2x8xf32> to vector<2x8x1xf32>
    %cst_9 = arith.constant 3.200000e+01 : f32
    %10 = vector.broadcast %cst_9 : f32 to vector<2x8x1xf32>
    %11 = arith.divf %9, %10 : vector<2x8x1xf32>
    %12 = vector.broadcast %11 : vector<2x8x1xf32> to vector<2x8x32xf32>
    %13 = arith.subf %3, %12 : vector<2x8x32xf32>
    %14 = arith.mulf %13, %13 : vector<2x8x32xf32>
    %cst_10 = arith.constant dense<0.000000e+00> : vector<2x8xf32>
    %15 = vector.multi_reduction <add>, %14, %cst_10 [2] : vector<2x8x32xf32> to vector<2x8xf32>
    %16 = vector.shape_cast %15 : vector<2x8xf32> to vector<2x8x1xf32>
    %cst_11 = arith.constant 3.200000e+01 : f32
    %17 = vector.broadcast %cst_11 : f32 to vector<2x8x1xf32>
    %18 = arith.divf %16, %17 : vector<2x8x1xf32>
    %19 = vector.broadcast %11 : vector<2x8x1xf32> to vector<2x8x32xf32>
    %20 = arith.subf %3, %19 : vector<2x8x32xf32>
    %cst_12 = arith.constant 9.99999974E-6 : f32
    %21 = vector.broadcast %cst_12 : f32 to vector<2x8x1xf32>
    %22 = arith.addf %18, %21 : vector<2x8x1xf32>
    %23 = math.rsqrt %22 : vector<2x8x1xf32>
    %24 = vector.broadcast %23 : vector<2x8x1xf32> to vector<2x8x32xf32>
    %25 = arith.mulf %20, %24 : vector<2x8x32xf32>
    %26 = vector.shape_cast %5 : vector<32xf32> to vector<1x1x32xf32>
    %27 = vector.broadcast %26 : vector<1x1x32xf32> to vector<2x8x32xf32>
    %28 = arith.mulf %25, %27 : vector<2x8x32xf32>
    %29 = vector.shape_cast %7 : vector<32xf32> to vector<1x1x32xf32>
    %30 = vector.broadcast %29 : vector<1x1x32xf32> to vector<2x8x32xf32>
    %31 = arith.addf %28, %30 : vector<2x8x32xf32>
    %32 = vector.shape_cast %31 : vector<2x8x32xf32> to vector<16x32xf32>
    %33 = arith.truncf %32 : vector<16x32xf32> to vector<16x32xbf16>
    %c0_13 = arith.constant 0 : index
    %c0_14 = arith.constant 0 : index
    %c0_15 = arith.constant 0 : index
    %c0_16 = arith.constant 0 : index
    %c0_17 = arith.constant 0 : index
    %34 = vector.load %arg6[%c0_13, %c0_14, %c0_15, %c0_16, %c0_17] : memref<1x3x4x32x8xbf16, #tpu.memory_space<vmem>>, vector<1x1x1x32x8xbf16>
    %35 = vector.shape_cast %34 : vector<1x1x1x32x8xbf16> to vector<32x8xbf16>
    %cst_18 = arith.constant dense<0.000000e+00> : vector<16x8xf32>
    %36 = tpu.matmul %33, %35, %cst_18 {dimension_numbers = #tpu.dot_dimension_numbers<[1], [0], [0], [1], [0, 0, 1, 1], [], []>} : vector<16x32xbf16>, vector<32x8xbf16>, vector<16x8xf32> -> vector<16x8xf32>
    %c0_19 = arith.constant 0 : index
    %c0_20 = arith.constant 0 : index
    %c0_21 = arith.constant 0 : index
    %c0_22 = arith.constant 0 : index
    %37 = vector.load %arg7[%c0_19, %c0_20, %c0_21, %c0_22] : memref<1x3x4x8xf32, #tpu.memory_space<vmem>>, vector<1x1x1x8xf32>
    %38 = vector.shape_cast %37 : vector<1x1x1x8xf32> to vector<8xf32>
    %39 = vector.shape_cast %38 : vector<8xf32> to vector<1x8xf32>
    %40 = vector.broadcast %39 : vector<1x8xf32> to vector<16x8xf32>
    %41 = arith.addf %36, %40 : vector<16x8xf32>
    %c0_23 = arith.constant 0 : index
    %c1 = arith.constant 1 : index
    %c0_24 = arith.constant 0 : index
    %c0_25 = arith.constant 0 : index
    %c0_26 = arith.constant 0 : index
    %42 = vector.load %arg6[%c0_23, %c1, %c0_24, %c0_25, %c0_26] : memref<1x3x4x32x8xbf16, #tpu.memory_space<vmem>>, vector<1x1x1x32x8xbf16>
    %43 = vector.shape_cast %42 : vector<1x1x1x32x8xbf16> to vector<32x8xbf16>
    %cst_27 = arith.constant dense<0.000000e+00> : vector<16x8xf32>
    %44 = tpu.matmul %33, %43, %cst_27 {dimension_numbers = #tpu.dot_dimension_numbers<[1], [0], [0], [1], [0, 0, 1, 1], [], []>} : vector<16x32xbf16>, vector<32x8xbf16>, vector<16x8xf32> -> vector<16x8xf32>
    %c0_28 = arith.constant 0 : index
    %c1_29 = arith.constant 1 : index
    %c0_30 = arith.constant 0 : index
    %c0_31 = arith.constant 0 : index
    %45 = vector.load %arg7[%c0_28, %c1_29, %c0_30, %c0_31] : memref<1x3x4x8xf32, #tpu.memory_space<vmem>>, vector<1x1x1x8xf32>
    %46 = vector.shape_cast %45 : vector<1x1x1x8xf32> to vector<8xf32>
    %47 = vector.shape_cast %46 : vector<8xf32> to vector<1x8xf32>
    %48 = vector.broadcast %47 : vector<1x8xf32> to vector<16x8xf32>
    %49 = arith.addf %44, %48 : vector<16x8xf32>
    %c0_32 = arith.constant 0 : index
    %c2 = arith.constant 2 : index
    %c0_33 = arith.constant 0 : index
    %c0_34 = arith.constant 0 : index
    %c0_35 = arith.constant 0 : index
    %50 = vector.load %arg6[%c0_32, %c2, %c0_33, %c0_34, %c0_35] : memref<1x3x4x32x8xbf16, #tpu.memory_space<vmem>>, vector<1x1x1x32x8xbf16>
    %51 = vector.shape_cast %50 : vector<1x1x1x32x8xbf16> to vector<32x8xbf16>
    %cst_36 = arith.constant dense<0.000000e+00> : vector<16x8xf32>
    %52 = tpu.matmul %33, %51, %cst_36 {dimension_numbers = #tpu.dot_dimension_numbers<[1], [0], [0], [1], [0, 0, 1, 1], [], []>} : vector<16x32xbf16>, vector<32x8xbf16>, vector<16x8xf32> -> vector<16x8xf32>
    %c0_37 = arith.constant 0 : index
    %c2_38 = arith.constant 2 : index
    %c0_39 = arith.constant 0 : index
    %c0_40 = arith.constant 0 : index
    %53 = vector.load %arg7[%c0_37, %c2_38, %c0_39, %c0_40] : memref<1x3x4x8xf32, #tpu.memory_space<vmem>>, vector<1x1x1x8xf32>
    %54 = vector.shape_cast %53 : vector<1x1x1x8xf32> to vector<8xf32>
    %55 = vector.shape_cast %54 : vector<8xf32> to vector<1x8xf32>
    %56 = vector.broadcast %55 : vector<1x8xf32> to vector<16x8xf32>
    %57 = arith.addf %52, %56 : vector<16x8xf32>
    %cst_41 = arith.constant 0.353553385 : f32
    %58 = vector.broadcast %cst_41 : f32 to vector<16x8xf32>
    %59 = arith.mulf %41, %58 : vector<16x8xf32>
    %60 = vector.shape_cast %59 : vector<16x8xf32> to vector<2x8x8xf32>
    %61 = vector.shape_cast %49 : vector<16x8xf32> to vector<2x8x8xf32>
    %62 = vector.shape_cast %57 : vector<16x8xf32> to vector<2x8x8xf32>
    %c0_42 = arith.constant 0 : index
    %c0_43 = arith.constant 0 : index
    %c1_44 = arith.constant 1 : index
    %c0_45 = arith.constant 0 : index
    %c0_46 = arith.constant 0 : index
    %63 = vector.load %arg6[%c0_42, %c0_43, %c1_44, %c0_45, %c0_46] : memref<1x3x4x32x8xbf16, #tpu.memory_space<vmem>>, vector<1x1x1x32x8xbf16>
    %64 = vector.shape_cast %63 : vector<1x1x1x32x8xbf16> to vector<32x8xbf16>
    %cst_47 = arith.constant dense<0.000000e+00> : vector<16x8xf32>
    %65 = tpu.matmul %33, %64, %cst_47 {dimension_numbers = #tpu.dot_dimension_numbers<[1], [0], [0], [1], [0, 0, 1, 1], [], []>} : vector<16x32xbf16>, vector<32x8xbf16>, vector<16x8xf32> -> vector<16x8xf32>
    %c0_48 = arith.constant 0 : index
    %c0_49 = arith.constant 0 : index
    %c1_50 = arith.constant 1 : index
    %c0_51 = arith.constant 0 : index
    %66 = vector.load %arg7[%c0_48, %c0_49, %c1_50, %c0_51] : memref<1x3x4x8xf32, #tpu.memory_space<vmem>>, vector<1x1x1x8xf32>
    %67 = vector.shape_cast %66 : vector<1x1x1x8xf32> to vector<8xf32>
    %68 = vector.shape_cast %67 : vector<8xf32> to vector<1x8xf32>
    %69 = vector.broadcast %68 : vector<1x8xf32> to vector<16x8xf32>
    %70 = arith.addf %65, %69 : vector<16x8xf32>
    %c0_52 = arith.constant 0 : index
    %c1_53 = arith.constant 1 : index
    %c1_54 = arith.constant 1 : index
    %c0_55 = arith.constant 0 : index
    %c0_56 = arith.constant 0 : index
    %71 = vector.load %arg6[%c0_52, %c1_53, %c1_54, %c0_55, %c0_56] : memref<1x3x4x32x8xbf16, #tpu.memory_space<vmem>>, vector<1x1x1x32x8xbf16>
    %72 = vector.shape_cast %71 : vector<1x1x1x32x8xbf16> to vector<32x8xbf16>
    %cst_57 = arith.constant dense<0.000000e+00> : vector<16x8xf32>
    %73 = tpu.matmul %33, %72, %cst_57 {dimension_numbers = #tpu.dot_dimension_numbers<[1], [0], [0], [1], [0, 0, 1, 1], [], []>} : vector<16x32xbf16>, vector<32x8xbf16>, vector<16x8xf32> -> vector<16x8xf32>
    %c0_58 = arith.constant 0 : index
    %c1_59 = arith.constant 1 : index
    %c1_60 = arith.constant 1 : index
    %c0_61 = arith.constant 0 : index
    %74 = vector.load %arg7[%c0_58, %c1_59, %c1_60, %c0_61] : memref<1x3x4x8xf32, #tpu.memory_space<vmem>>, vector<1x1x1x8xf32>
    %75 = vector.shape_cast %74 : vector<1x1x1x8xf32> to vector<8xf32>
    %76 = vector.shape_cast %75 : vector<8xf32> to vector<1x8xf32>
    %77 = vector.broadcast %76 : vector<1x8xf32> to vector<16x8xf32>
    %78 = arith.addf %73, %77 : vector<16x8xf32>
    %c0_62 = arith.constant 0 : index
    %c2_63 = arith.constant 2 : index
    %c1_64 = arith.constant 1 : index
    %c0_65 = arith.constant 0 : index
    %c0_66 = arith.constant 0 : index
    %79 = vector.load %arg6[%c0_62, %c2_63, %c1_64, %c0_65, %c0_66] : memref<1x3x4x32x8xbf16, #tpu.memory_space<vmem>>, vector<1x1x1x32x8xbf16>
    %80 = vector.shape_cast %79 : vector<1x1x1x32x8xbf16> to vector<32x8xbf16>
    %cst_67 = arith.constant dense<0.000000e+00> : vector<16x8xf32>
    %81 = tpu.matmul %33, %80, %cst_67 {dimension_numbers = #tpu.dot_dimension_numbers<[1], [0], [0], [1], [0, 0, 1, 1], [], []>} : vector<16x32xbf16>, vector<32x8xbf16>, vector<16x8xf32> -> vector<16x8xf32>
    %c0_68 = arith.constant 0 : index
    %c2_69 = arith.constant 2 : index
    %c1_70 = arith.constant 1 : index
    %c0_71 = arith.constant 0 : index
    %82 = vector.load %arg7[%c0_68, %c2_69, %c1_70, %c0_71] : memref<1x3x4x8xf32, #tpu.memory_space<vmem>>, vector<1x1x1x8xf32>
    %83 = vector.shape_cast %82 : vector<1x1x1x8xf32> to vector<8xf32>
    %84 = vector.shape_cast %83 : vector<8xf32> to vector<1x8xf32>
    %85 = vector.broadcast %84 : vector<1x8xf32> to vector<16x8xf32>
    %86 = arith.addf %81, %85 : vector<16x8xf32>
    %cst_72 = arith.constant 0.353553385 : f32
    %87 = vector.broadcast %cst_72 : f32 to vector<16x8xf32>
    %88 = arith.mulf %70, %87 : vector<16x8xf32>
    %89 = vector.shape_cast %88 : vector<16x8xf32> to vector<2x8x8xf32>
    %90 = vector.shape_cast %78 : vector<16x8xf32> to vector<2x8x8xf32>
    %91 = vector.shape_cast %86 : vector<16x8xf32> to vector<2x8x8xf32>
    %c0_73 = arith.constant 0 : index
    %c0_74 = arith.constant 0 : index
    %c2_75 = arith.constant 2 : index
    %c0_76 = arith.constant 0 : index
    %c0_77 = arith.constant 0 : index
    %92 = vector.load %arg6[%c0_73, %c0_74, %c2_75, %c0_76, %c0_77] : memref<1x3x4x32x8xbf16, #tpu.memory_space<vmem>>, vector<1x1x1x32x8xbf16>
    %93 = vector.shape_cast %92 : vector<1x1x1x32x8xbf16> to vector<32x8xbf16>
    %cst_78 = arith.constant dense<0.000000e+00> : vector<16x8xf32>
    %94 = tpu.matmul %33, %93, %cst_78 {dimension_numbers = #tpu.dot_dimension_numbers<[1], [0], [0], [1], [0, 0, 1, 1], [], []>} : vector<16x32xbf16>, vector<32x8xbf16>, vector<16x8xf32> -> vector<16x8xf32>
    %c0_79 = arith.constant 0 : index
    %c0_80 = arith.constant 0 : index
    %c2_81 = arith.constant 2 : index
    %c0_82 = arith.constant 0 : index
    %95 = vector.load %arg7[%c0_79, %c0_80, %c2_81, %c0_82] : memref<1x3x4x8xf32, #tpu.memory_space<vmem>>, vector<1x1x1x8xf32>
    %96 = vector.shape_cast %95 : vector<1x1x1x8xf32> to vector<8xf32>
    %97 = vector.shape_cast %96 : vector<8xf32> to vector<1x8xf32>
    %98 = vector.broadcast %97 : vector<1x8xf32> to vector<16x8xf32>
    %99 = arith.addf %94, %98 : vector<16x8xf32>
    %c0_83 = arith.constant 0 : index
    %c1_84 = arith.constant 1 : index
    %c2_85 = arith.constant 2 : index
    %c0_86 = arith.constant 0 : index
    %c0_87 = arith.constant 0 : index
    %100 = vector.load %arg6[%c0_83, %c1_84, %c2_85, %c0_86, %c0_87] : memref<1x3x4x32x8xbf16, #tpu.memory_space<vmem>>, vector<1x1x1x32x8xbf16>
    %101 = vector.shape_cast %100 : vector<1x1x1x32x8xbf16> to vector<32x8xbf16>
    %cst_88 = arith.constant dense<0.000000e+00> : vector<16x8xf32>
    %102 = tpu.matmul %33, %101, %cst_88 {dimension_numbers = #tpu.dot_dimension_numbers<[1], [0], [0], [1], [0, 0, 1, 1], [], []>} : vector<16x32xbf16>, vector<32x8xbf16>, vector<16x8xf32> -> vector<16x8xf32>
    %c0_89 = arith.constant 0 : index
    %c1_90 = arith.constant 1 : index
    %c2_91 = arith.constant 2 : index
    %c0_92 = arith.constant 0 : index
    %103 = vector.load %arg7[%c0_89, %c1_90, %c2_91, %c0_92] : memref<1x3x4x8xf32, #tpu.memory_space<vmem>>, vector<1x1x1x8xf32>
    %104 = vector.shape_cast %103 : vector<1x1x1x8xf32> to vector<8xf32>
    %105 = vector.shape_cast %104 : vector<8xf32> to vector<1x8xf32>
    %106 = vector.broadcast %105 : vector<1x8xf32> to vector<16x8xf32>
    %107 = arith.addf %102, %106 : vector<16x8xf32>
    %c0_93 = arith.constant 0 : index
    %c2_94 = arith.constant 2 : index
    %c2_95 = arith.constant 2 : index
    %c0_96 = arith.constant 0 : index
    %c0_97 = arith.constant 0 : index
    %108 = vector.load %arg6[%c0_93, %c2_94, %c2_95, %c0_96, %c0_97] : memref<1x3x4x32x8xbf16, #tpu.memory_space<vmem>>, vector<1x1x1x32x8xbf16>
    %109 = vector.shape_cast %108 : vector<1x1x1x32x8xbf16> to vector<32x8xbf16>
    %cst_98 = arith.constant dense<0.000000e+00> : vector<16x8xf32>
    %110 = tpu.matmul %33, %109, %cst_98 {dimension_numbers = #tpu.dot_dimension_numbers<[1], [0], [0], [1], [0, 0, 1, 1], [], []>} : vector<16x32xbf16>, vector<32x8xbf16>, vector<16x8xf32> -> vector<16x8xf32>
    %c0_99 = arith.constant 0 : index
    %c2_100 = arith.constant 2 : index
    %c2_101 = arith.constant 2 : index
    %c0_102 = arith.constant 0 : index
    %111 = vector.load %arg7[%c0_99, %c2_100, %c2_101, %c0_102] : memref<1x3x4x8xf32, #tpu.memory_space<vmem>>, vector<1x1x1x8xf32>
    %112 = vector.shape_cast %111 : vector<1x1x1x8xf32> to vector<8xf32>
    %113 = vector.shape_cast %112 : vector<8xf32> to vector<1x8xf32>
    %114 = vector.broadcast %113 : vector<1x8xf32> to vector<16x8xf32>
    %115 = arith.addf %110, %114 : vector<16x8xf32>
    %cst_103 = arith.constant 0.353553385 : f32
    %116 = vector.broadcast %cst_103 : f32 to vector<16x8xf32>
    %117 = arith.mulf %99, %116 : vector<16x8xf32>
    %118 = vector.shape_cast %117 : vector<16x8xf32> to vector<2x8x8xf32>
    %119 = vector.shape_cast %107 : vector<16x8xf32> to vector<2x8x8xf32>
    %120 = vector.shape_cast %115 : vector<16x8xf32> to vector<2x8x8xf32>
    %c0_104 = arith.constant 0 : index
    %c0_105 = arith.constant 0 : index
    %c3 = arith.constant 3 : index
    %c0_106 = arith.constant 0 : index
    %c0_107 = arith.constant 0 : index
    %121 = vector.load %arg6[%c0_104, %c0_105, %c3, %c0_106, %c0_107] : memref<1x3x4x32x8xbf16, #tpu.memory_space<vmem>>, vector<1x1x1x32x8xbf16>
    %122 = vector.shape_cast %121 : vector<1x1x1x32x8xbf16> to vector<32x8xbf16>
    %cst_108 = arith.constant dense<0.000000e+00> : vector<16x8xf32>
    %123 = tpu.matmul %33, %122, %cst_108 {dimension_numbers = #tpu.dot_dimension_numbers<[1], [0], [0], [1], [0, 0, 1, 1], [], []>} : vector<16x32xbf16>, vector<32x8xbf16>, vector<16x8xf32> -> vector<16x8xf32>
    %c0_109 = arith.constant 0 : index
    %c0_110 = arith.constant 0 : index
    %c3_111 = arith.constant 3 : index
    %c0_112 = arith.constant 0 : index
    %124 = vector.load %arg7[%c0_109, %c0_110, %c3_111, %c0_112] : memref<1x3x4x8xf32, #tpu.memory_space<vmem>>, vector<1x1x1x8xf32>
    %125 = vector.shape_cast %124 : vector<1x1x1x8xf32> to vector<8xf32>
    %126 = vector.shape_cast %125 : vector<8xf32> to vector<1x8xf32>
    %127 = vector.broadcast %126 : vector<1x8xf32> to vector<16x8xf32>
    %128 = arith.addf %123, %127 : vector<16x8xf32>
    %c0_113 = arith.constant 0 : index
    %c1_114 = arith.constant 1 : index
    %c3_115 = arith.constant 3 : index
    %c0_116 = arith.constant 0 : index
    %c0_117 = arith.constant 0 : index
    %129 = vector.load %arg6[%c0_113, %c1_114, %c3_115, %c0_116, %c0_117] : memref<1x3x4x32x8xbf16, #tpu.memory_space<vmem>>, vector<1x1x1x32x8xbf16>
    %130 = vector.shape_cast %129 : vector<1x1x1x32x8xbf16> to vector<32x8xbf16>
    %cst_118 = arith.constant dense<0.000000e+00> : vector<16x8xf32>
    %131 = tpu.matmul %33, %130, %cst_118 {dimension_numbers = #tpu.dot_dimension_numbers<[1], [0], [0], [1], [0, 0, 1, 1], [], []>} : vector<16x32xbf16>, vector<32x8xbf16>, vector<16x8xf32> -> vector<16x8xf32>
    %c0_119 = arith.constant 0 : index
    %c1_120 = arith.constant 1 : index
    %c3_121 = arith.constant 3 : index
    %c0_122 = arith.constant 0 : index
    %132 = vector.load %arg7[%c0_119, %c1_120, %c3_121, %c0_122] : memref<1x3x4x8xf32, #tpu.memory_space<vmem>>, vector<1x1x1x8xf32>
    %133 = vector.shape_cast %132 : vector<1x1x1x8xf32> to vector<8xf32>
    %134 = vector.shape_cast %133 : vector<8xf32> to vector<1x8xf32>
    %135 = vector.broadcast %134 : vector<1x8xf32> to vector<16x8xf32>
    %136 = arith.addf %131, %135 : vector<16x8xf32>
    %c0_123 = arith.constant 0 : index
    %c2_124 = arith.constant 2 : index
    %c3_125 = arith.constant 3 : index
    %c0_126 = arith.constant 0 : index
    %c0_127 = arith.constant 0 : index
    %137 = vector.load %arg6[%c0_123, %c2_124, %c3_125, %c0_126, %c0_127] : memref<1x3x4x32x8xbf16, #tpu.memory_space<vmem>>, vector<1x1x1x32x8xbf16>
    %138 = vector.shape_cast %137 : vector<1x1x1x32x8xbf16> to vector<32x8xbf16>
    %cst_128 = arith.constant dense<0.000000e+00> : vector<16x8xf32>
    %139 = tpu.matmul %33, %138, %cst_128 {dimension_numbers = #tpu.dot_dimension_numbers<[1], [0], [0], [1], [0, 0, 1, 1], [], []>} : vector<16x32xbf16>, vector<32x8xbf16>, vector<16x8xf32> -> vector<16x8xf32>
    %c0_129 = arith.constant 0 : index
    %c2_130 = arith.constant 2 : index
    %c3_131 = arith.constant 3 : index
    %c0_132 = arith.constant 0 : index
    %140 = vector.load %arg7[%c0_129, %c2_130, %c3_131, %c0_132] : memref<1x3x4x8xf32, #tpu.memory_space<vmem>>, vector<1x1x1x8xf32>
    %141 = vector.shape_cast %140 : vector<1x1x1x8xf32> to vector<8xf32>
    %142 = vector.shape_cast %141 : vector<8xf32> to vector<1x8xf32>
    %143 = vector.broadcast %142 : vector<1x8xf32> to vector<16x8xf32>
    %144 = arith.addf %139, %143 : vector<16x8xf32>
    %cst_133 = arith.constant 0.353553385 : f32
    %145 = vector.broadcast %cst_133 : f32 to vector<16x8xf32>
    %146 = arith.mulf %128, %145 : vector<16x8xf32>
    %147 = vector.shape_cast %146 : vector<16x8xf32> to vector<2x8x8xf32>
    %148 = vector.shape_cast %136 : vector<16x8xf32> to vector<2x8x8xf32>
    %149 = vector.shape_cast %144 : vector<16x8xf32> to vector<2x8x8xf32>
    %150 = tpu.concatenate %60, %89, %118, %147 in 0 : vector<2x8x8xf32>, vector<2x8x8xf32>, vector<2x8x8xf32>, vector<2x8x8xf32> -> vector<8x8x8xf32>
    %151 = arith.truncf %150 : vector<8x8x8xf32> to vector<8x8x8xbf16>
    %152 = tpu.concatenate %61, %90, %119, %148 in 0 : vector<2x8x8xf32>, vector<2x8x8xf32>, vector<2x8x8xf32>, vector<2x8x8xf32> -> vector<8x8x8xf32>
    %153 = arith.truncf %152 : vector<8x8x8xf32> to vector<8x8x8xbf16>
    %154 = tpu.concatenate %62, %91, %120, %149 in 0 : vector<2x8x8xf32>, vector<2x8x8xf32>, vector<2x8x8xf32>, vector<2x8x8xf32> -> vector<8x8x8xf32>
    %155 = arith.truncf %154 : vector<8x8x8xf32> to vector<8x8x8xbf16>
    "tpu.trace_start"() <{level = 10 : i32, message = "nqd,nkd->nqk"}> : () -> ()
    %cst_134 = arith.constant dense<0.000000e+00> : vector<8x8x8xf32>
    %156 = tpu.matmul %151, %153, %cst_134 {dimension_numbers = #tpu.dot_dimension_numbers<[2], [2], [1], [1], [0, 0, 0, 1, 1, 1], [0], [0]>} : vector<8x8x8xbf16>, vector<8x8x8xbf16>, vector<8x8x8xf32> -> vector<8x8x8xf32>
    "tpu.trace_stop"() : () -> ()
    %157 = tpu.iota {dimensions = array<i32: 0>} : vector<8x8xi32>
    %158 = tpu.iota {dimensions = array<i32: 1>} : vector<8x8xi32>
    %159 = arith.cmpi sge, %157, %158 : vector<8x8xi32>
    %cst_135 = arith.constant 0.000000e+00 : f32
    %cst_136 = arith.constant -1.000000e+09 : f32
    %160 = vector.broadcast %cst_135 : f32 to vector<8x8xf32>
    %161 = vector.broadcast %cst_136 : f32 to vector<8x8xf32>
    %162 = arith.select %159, %160, %161 : vector<8x8xi1>, vector<8x8xf32>
    %163 = vector.shape_cast %162 : vector<8x8xf32> to vector<1x8x8xf32>
    %164 = vector.broadcast %163 : vector<1x8x8xf32> to vector<8x8x8xf32>
    %165 = arith.addf %156, %164 : vector<8x8x8xf32>
    %cst_137 = arith.constant dense<0xFF800000> : vector<8x8xf32>
    %166 = vector.multi_reduction <maximumf>, %165, %cst_137 [2] : vector<8x8x8xf32> to vector<8x8xf32>
    %167 = vector.shape_cast %166 : vector<8x8xf32> to vector<8x8x1xf32>
    %168 = vector.broadcast %167 : vector<8x8x1xf32> to vector<8x8x8xf32>
    %169 = arith.subf %165, %168 : vector<8x8x8xf32>
    %170 = math.exp %169 : vector<8x8x8xf32>
    %cst_138 = arith.constant dense<0.000000e+00> : vector<8x8xf32>
    %171 = vector.multi_reduction <add>, %170, %cst_138 [2] : vector<8x8x8xf32> to vector<8x8xf32>
    %172 = vector.shape_cast %171 : vector<8x8xf32> to vector<8x8x1xf32>
    %173 = tpu.reciprocal %172 {approx = true} : vector<8x8x1xf32> -> vector<8x8x1xf32>
    %174 = vector.broadcast %173 : vector<8x8x1xf32> to vector<8x8x8xf32>
    %175 = arith.mulf %170, %174 : vector<8x8x8xf32>
    %176 = arith.truncf %175 : vector<8x8x8xf32> to vector<8x8x8xbf16>
    "tpu.trace_start"() <{level = 10 : i32, message = "nqk,nkd->nqd"}> : () -> ()
    %cst_139 = arith.constant dense<0.000000e+00> : vector<8x8x8xf32>
    %177 = tpu.matmul %176, %155, %cst_139 {dimension_numbers = #tpu.dot_dimension_numbers<[2], [1], [1], [2], [0, 0, 0, 1, 1, 2], [0], [0]>} : vector<8x8x8xbf16>, vector<8x8x8xbf16>, vector<8x8x8xf32> -> vector<8x8x8xf32>
    "tpu.trace_stop"() : () -> ()
    %178 = vector.extract_strided_slice %177 {offsets = [0, 0, 0], sizes = [2, 8, 8], strides = [1, 1, 1]} : vector<8x8x8xf32> to vector<2x8x8xf32>
    %179 = vector.shape_cast %178 : vector<2x8x8xf32> to vector<16x8xf32>
    %180 = arith.truncf %179 : vector<16x8xf32> to vector<16x8xbf16>
    %c0_140 = arith.constant 0 : index
    %c0_141 = arith.constant 0 : index
    %c0_142 = arith.constant 0 : index
    %c0_143 = arith.constant 0 : index
    %181 = vector.load %arg8[%c0_140, %c0_141, %c0_142, %c0_143] : memref<1x4x8x32xbf16, #tpu.memory_space<vmem>>, vector<1x1x8x32xbf16>
    %182 = vector.shape_cast %181 : vector<1x1x8x32xbf16> to vector<8x32xbf16>
    %cst_144 = arith.constant dense<0.000000e+00> : vector<16x32xf32>
    %183 = tpu.matmul %180, %182, %cst_144 {dimension_numbers = #tpu.dot_dimension_numbers<[1], [0], [0], [1], [0, 0, 1, 1], [], []>} : vector<16x8xbf16>, vector<8x32xbf16>, vector<16x32xf32> -> vector<16x32xf32>
    %184 = vector.extract_strided_slice %177 {offsets = [2, 0, 0], sizes = [2, 8, 8], strides = [1, 1, 1]} : vector<8x8x8xf32> to vector<2x8x8xf32>
    %185 = vector.shape_cast %184 : vector<2x8x8xf32> to vector<16x8xf32>
    %186 = arith.truncf %185 : vector<16x8xf32> to vector<16x8xbf16>
    %c0_145 = arith.constant 0 : index
    %c1_146 = arith.constant 1 : index
    %c0_147 = arith.constant 0 : index
    %c0_148 = arith.constant 0 : index
    %187 = vector.load %arg8[%c0_145, %c1_146, %c0_147, %c0_148] : memref<1x4x8x32xbf16, #tpu.memory_space<vmem>>, vector<1x1x8x32xbf16>
    %188 = vector.shape_cast %187 : vector<1x1x8x32xbf16> to vector<8x32xbf16>
    %cst_149 = arith.constant dense<0.000000e+00> : vector<16x32xf32>
    %189 = tpu.matmul %186, %188, %cst_149 {dimension_numbers = #tpu.dot_dimension_numbers<[1], [0], [0], [1], [0, 0, 1, 1], [], []>} : vector<16x8xbf16>, vector<8x32xbf16>, vector<16x32xf32> -> vector<16x32xf32>
    %190 = arith.addf %183, %189 : vector<16x32xf32>
    %191 = vector.extract_strided_slice %177 {offsets = [4, 0, 0], sizes = [2, 8, 8], strides = [1, 1, 1]} : vector<8x8x8xf32> to vector<2x8x8xf32>
    %192 = vector.shape_cast %191 : vector<2x8x8xf32> to vector<16x8xf32>
    %193 = arith.truncf %192 : vector<16x8xf32> to vector<16x8xbf16>
    %c0_150 = arith.constant 0 : index
    %c2_151 = arith.constant 2 : index
    %c0_152 = arith.constant 0 : index
    %c0_153 = arith.constant 0 : index
    %194 = vector.load %arg8[%c0_150, %c2_151, %c0_152, %c0_153] : memref<1x4x8x32xbf16, #tpu.memory_space<vmem>>, vector<1x1x8x32xbf16>
    %195 = vector.shape_cast %194 : vector<1x1x8x32xbf16> to vector<8x32xbf16>
    %cst_154 = arith.constant dense<0.000000e+00> : vector<16x32xf32>
    %196 = tpu.matmul %193, %195, %cst_154 {dimension_numbers = #tpu.dot_dimension_numbers<[1], [0], [0], [1], [0, 0, 1, 1], [], []>} : vector<16x8xbf16>, vector<8x32xbf16>, vector<16x32xf32> -> vector<16x32xf32>
    %197 = arith.addf %190, %196 : vector<16x32xf32>
    %198 = vector.extract_strided_slice %177 {offsets = [6, 0, 0], sizes = [2, 8, 8], strides = [1, 1, 1]} : vector<8x8x8xf32> to vector<2x8x8xf32>
    %199 = vector.shape_cast %198 : vector<2x8x8xf32> to vector<16x8xf32>
    %200 = arith.truncf %199 : vector<16x8xf32> to vector<16x8xbf16>
    %c0_155 = arith.constant 0 : index
    %c3_156 = arith.constant 3 : index
    %c0_157 = arith.constant 0 : index
    %c0_158 = arith.constant 0 : index
    %201 = vector.load %arg8[%c0_155, %c3_156, %c0_157, %c0_158] : memref<1x4x8x32xbf16, #tpu.memory_space<vmem>>, vector<1x1x8x32xbf16>
    %202 = vector.shape_cast %201 : vector<1x1x8x32xbf16> to vector<8x32xbf16>
    %cst_159 = arith.constant dense<0.000000e+00> : vector<16x32xf32>
    %203 = tpu.matmul %200, %202, %cst_159 {dimension_numbers = #tpu.dot_dimension_numbers<[1], [0], [0], [1], [0, 0, 1, 1], [], []>} : vector<16x8xbf16>, vector<8x32xbf16>, vector<16x32xf32> -> vector<16x32xf32>
    %204 = arith.addf %197, %203 : vector<16x32xf32>
    %c0_160 = arith.constant 0 : index
    %c0_161 = arith.constant 0 : index
    %c0_162 = arith.constant 0 : index
    %205 = vector.load %arg9[%c0_160, %c0_161, %c0_162] : memref<1x1x32xf32, #tpu.memory_space<vmem>>, vector<1x1x32xf32>
    %206 = vector.shape_cast %205 : vector<1x1x32xf32> to vector<32xf32>
    %207 = vector.shape_cast %206 : vector<32xf32> to vector<1x32xf32>
    %208 = vector.broadcast %207 : vector<1x32xf32> to vector<16x32xf32>
    %209 = arith.addf %204, %208 : vector<16x32xf32>
    %210 = vector.shape_cast %209 : vector<16x32xf32> to vector<2x8x32xf32>
    %211 = arith.addf %3, %210 : vector<2x8x32xf32>
    %c0_163 = arith.constant 0 : index
    %c0_164 = arith.constant 0 : index
    %c0_165 = arith.constant 0 : index
    %212 = vector.load %arg10[%c0_163, %c0_164, %c0_165] : memref<1x1x32xf32, #tpu.memory_space<vmem>>, vector<1x1x32xf32>
    %213 = vector.shape_cast %212 : vector<1x1x32xf32> to vector<32xf32>
    %c0_166 = arith.constant 0 : index
    %c0_167 = arith.constant 0 : index
    %c0_168 = arith.constant 0 : index
    %214 = vector.load %arg11[%c0_166, %c0_167, %c0_168] : memref<1x1x32xf32, #tpu.memory_space<vmem>>, vector<1x1x32xf32>
    %215 = vector.shape_cast %214 : vector<1x1x32xf32> to vector<32xf32>
    %cst_169 = arith.constant dense<0.000000e+00> : vector<2x8xf32>
    %216 = vector.multi_reduction <add>, %211, %cst_169 [2] : vector<2x8x32xf32> to vector<2x8xf32>
    %217 = vector.shape_cast %216 : vector<2x8xf32> to vector<2x8x1xf32>
    %cst_170 = arith.constant 3.200000e+01 : f32
    %218 = vector.broadcast %cst_170 : f32 to vector<2x8x1xf32>
    %219 = arith.divf %217, %218 : vector<2x8x1xf32>
    %220 = vector.broadcast %219 : vector<2x8x1xf32> to vector<2x8x32xf32>
    %221 = arith.subf %211, %220 : vector<2x8x32xf32>
    %222 = arith.mulf %221, %221 : vector<2x8x32xf32>
    %cst_171 = arith.constant dense<0.000000e+00> : vector<2x8xf32>
    %223 = vector.multi_reduction <add>, %222, %cst_171 [2] : vector<2x8x32xf32> to vector<2x8xf32>
    %224 = vector.shape_cast %223 : vector<2x8xf32> to vector<2x8x1xf32>
    %cst_172 = arith.constant 3.200000e+01 : f32
    %225 = vector.broadcast %cst_172 : f32 to vector<2x8x1xf32>
    %226 = arith.divf %224, %225 : vector<2x8x1xf32>
    %227 = vector.broadcast %219 : vector<2x8x1xf32> to vector<2x8x32xf32>
    %228 = arith.subf %211, %227 : vector<2x8x32xf32>
    %cst_173 = arith.constant 9.99999974E-6 : f32
    %229 = vector.broadcast %cst_173 : f32 to vector<2x8x1xf32>
    %230 = arith.addf %226, %229 : vector<2x8x1xf32>
    %231 = math.rsqrt %230 : vector<2x8x1xf32>
    %232 = vector.broadcast %231 : vector<2x8x1xf32> to vector<2x8x32xf32>
    %233 = arith.mulf %228, %232 : vector<2x8x32xf32>
    %234 = vector.shape_cast %213 : vector<32xf32> to vector<1x1x32xf32>
    %235 = vector.broadcast %234 : vector<1x1x32xf32> to vector<2x8x32xf32>
    %236 = arith.mulf %233, %235 : vector<2x8x32xf32>
    %237 = vector.shape_cast %215 : vector<32xf32> to vector<1x1x32xf32>
    %238 = vector.broadcast %237 : vector<1x1x32xf32> to vector<2x8x32xf32>
    %239 = arith.addf %236, %238 : vector<2x8x32xf32>
    %240 = vector.shape_cast %239 : vector<2x8x32xf32> to vector<16x32xf32>
    %241 = arith.truncf %240 : vector<16x32xf32> to vector<16x32xbf16>
    %c0_174 = arith.constant 0 : index
    %c0_175 = arith.constant 0 : index
    %c0_176 = arith.constant 0 : index
    %242 = vector.load %arg12[%c0_174, %c0_175, %c0_176] : memref<1x32x128xbf16, #tpu.memory_space<vmem>>, vector<1x32x128xbf16>
    %243 = vector.shape_cast %242 : vector<1x32x128xbf16> to vector<32x128xbf16>
    %cst_177 = arith.constant dense<0.000000e+00> : vector<16x128xf32>
    %244 = tpu.matmul %241, %243, %cst_177 {dimension_numbers = #tpu.dot_dimension_numbers<[1], [0], [0], [1], [0, 0, 1, 1], [], []>} : vector<16x32xbf16>, vector<32x128xbf16>, vector<16x128xf32> -> vector<16x128xf32>
    %c0_178 = arith.constant 0 : index
    %c0_179 = arith.constant 0 : index
    %c0_180 = arith.constant 0 : index
    %245 = vector.load %arg13[%c0_178, %c0_179, %c0_180] : memref<1x1x128xf32, #tpu.memory_space<vmem>>, vector<1x1x128xf32>
    %246 = vector.shape_cast %245 : vector<1x1x128xf32> to vector<128xf32>
    %247 = vector.shape_cast %246 : vector<128xf32> to vector<1x128xf32>
    %248 = vector.broadcast %247 : vector<1x128xf32> to vector<16x128xf32>
    %249 = arith.addf %244, %248 : vector<16x128xf32>
    %cst_181 = arith.constant 1.702000e+00 : f32
    %250 = vector.broadcast %cst_181 : f32 to vector<16x128xf32>
    %251 = arith.mulf %250, %249 : vector<16x128xf32>
    %252 = arith.negf %251 : vector<16x128xf32>
    %253 = math.exp %252 : vector<16x128xf32>
    %cst_182 = arith.constant 1.000000e+00 : f32
    %254 = vector.broadcast %cst_182 : f32 to vector<16x128xf32>
    %255 = arith.addf %254, %253 : vector<16x128xf32>
    %256 = arith.divf %254, %255 : vector<16x128xf32>
    %257 = arith.mulf %249, %256 : vector<16x128xf32>
    %258 = arith.truncf %257 : vector<16x128xf32> to vector<16x128xbf16>
    %c0_183 = arith.constant 0 : index
    %c0_184 = arith.constant 0 : index
    %c0_185 = arith.constant 0 : index
    %259 = vector.load %arg14[%c0_183, %c0_184, %c0_185] : memref<1x128x32xbf16, #tpu.memory_space<vmem>>, vector<1x128x32xbf16>
    %260 = vector.shape_cast %259 : vector<1x128x32xbf16> to vector<128x32xbf16>
    %cst_186 = arith.constant dense<0.000000e+00> : vector<16x32xf32>
    %261 = tpu.matmul %258, %260, %cst_186 {dimension_numbers = #tpu.dot_dimension_numbers<[1], [0], [0], [1], [0, 0, 1, 1], [], []>} : vector<16x128xbf16>, vector<128x32xbf16>, vector<16x32xf32> -> vector<16x32xf32>
    %c0_187 = arith.constant 0 : index
    %c0_188 = arith.constant 0 : index
    %c0_189 = arith.constant 0 : index
    %262 = vector.load %arg15[%c0_187, %c0_188, %c0_189] : memref<1x1x32xf32, #tpu.memory_space<vmem>>, vector<1x1x32xf32>
    %263 = vector.shape_cast %262 : vector<1x1x32xf32> to vector<32xf32>
    %264 = vector.shape_cast %263 : vector<32xf32> to vector<1x32xf32>
    %265 = vector.broadcast %264 : vector<1x32xf32> to vector<16x32xf32>
    %266 = arith.addf %261, %265 : vector<16x32xf32>
    %267 = vector.shape_cast %266 : vector<16x32xf32> to vector<2x8x32xf32>
    %268 = arith.addf %211, %267 : vector<2x8x32xf32>
    %c0_190 = arith.constant 0 : index
    %c0_191 = arith.constant 0 : index
    %c0_192 = arith.constant 0 : index
    %269 = vector.load %arg20[%c0_190, %c0_191, %c0_192] : memref<2x8x32xf32, #tpu.memory_space<vmem>>, vector<2x8x32xf32>
    tpu.vector_store %arg20[%c0_190, %c0_191, %c0_192], %268 {strides = array<i32>} : memref<2x8x32xf32, #tpu.memory_space<vmem>>, vector<2x8x32xf32>,
    %c1_i32 = arith.constant 1 : i32
    %270 = arith.cmpi eq, %arg0, %c1_i32 : i32
    %271 = arith.extui %270 : i1 to i32
    %c0_i32_193 = arith.constant 0 : i32
    %272 = arith.cmpi ne, %271, %c0_i32_193 : i32
    scf.if %272 {
      %c0_194 = arith.constant 0 : index
      %273 = memref.load %arg1[%c0_194] : memref<2xi32, #tpu.memory_space<smem>>
      %c0_195 = arith.constant 0 : index
      %274 = arith.index_cast %273 : i32 to index
      %c0_196 = arith.constant 0 : index
      %275 = vector.load %arg20[%c0_195, %274, %c0_196] : memref<2x8x32xf32, #tpu.memory_space<vmem>>, vector<1x1x32xf32>
      %276 = vector.shape_cast %275 : vector<1x1x32xf32> to vector<1x32xf32>
      %c1_197 = arith.constant 1 : index
      %277 = memref.load %arg1[%c1_197] : memref<2xi32, #tpu.memory_space<smem>>
      %c1_198 = arith.constant 1 : index
      %278 = arith.index_cast %277 : i32 to index
      %c0_199 = arith.constant 0 : index
      %279 = vector.load %arg20[%c1_198, %278, %c0_199] : memref<2x8x32xf32, #tpu.memory_space<vmem>>, vector<1x1x32xf32>
      %280 = vector.shape_cast %279 : vector<1x1x32xf32> to vector<1x32xf32>
      %281 = tpu.concatenate %276, %280 in 0 : vector<1x32xf32>, vector<1x32xf32> -> vector<2x32xf32>
      %c0_200 = arith.constant 0 : index
      %c0_201 = arith.constant 0 : index
      %282 = vector.load %arg16[%c0_200, %c0_201] : memref<1x32xf32, #tpu.memory_space<vmem>>, vector<1x32xf32>
      %283 = vector.shape_cast %282 : vector<1x32xf32> to vector<32xf32>
      %c0_202 = arith.constant 0 : index
      %c0_203 = arith.constant 0 : index
      %284 = vector.load %arg17[%c0_202, %c0_203] : memref<1x32xf32, #tpu.memory_space<vmem>>, vector<1x32xf32>
      %285 = vector.shape_cast %284 : vector<1x32xf32> to vector<32xf32>
      %cst_204 = arith.constant dense<0.000000e+00> : vector<2xf32>
      %286 = vector.multi_reduction <add>, %281, %cst_204 [1] : vector<2x32xf32> to vector<2xf32>
      %287 = vector.shape_cast %286 : vector<2xf32> to vector<2x1xf32>
      %cst_205 = arith.constant 3.200000e+01 : f32
      %288 = vector.broadcast %cst_205 : f32 to vector<2x1xf32>
      %289 = arith.divf %287, %288 : vector<2x1xf32>
      %290 = vector.broadcast %289 : vector<2x1xf32> to vector<2x32xf32>
      %291 = arith.subf %281, %290 : vector<2x32xf32>
      %292 = arith.mulf %291, %291 : vector<2x32xf32>
      %cst_206 = arith.constant dense<0.000000e+00> : vector<2xf32>
      %293 = vector.multi_reduction <add>, %292, %cst_206 [1] : vector<2x32xf32> to vector<2xf32>
      %294 = vector.shape_cast %293 : vector<2xf32> to vector<2x1xf32>
      %cst_207 = arith.constant 3.200000e+01 : f32
      %295 = vector.broadcast %cst_207 : f32 to vector<2x1xf32>
      %296 = arith.divf %294, %295 : vector<2x1xf32>
      %297 = vector.broadcast %289 : vector<2x1xf32> to vector<2x32xf32>
      %298 = arith.subf %281, %297 : vector<2x32xf32>
      %cst_208 = arith.constant 9.99999974E-6 : f32
      %299 = vector.broadcast %cst_208 : f32 to vector<2x1xf32>
      %300 = arith.addf %296, %299 : vector<2x1xf32>
      %301 = math.rsqrt %300 : vector<2x1xf32>
      %302 = vector.broadcast %301 : vector<2x1xf32> to vector<2x32xf32>
      %303 = arith.mulf %298, %302 : vector<2x32xf32>
      %304 = vector.shape_cast %283 : vector<32xf32> to vector<1x32xf32>
      %305 = vector.broadcast %304 : vector<1x32xf32> to vector<2x32xf32>
      %306 = arith.mulf %303, %305 : vector<2x32xf32>
      %307 = vector.shape_cast %285 : vector<32xf32> to vector<1x32xf32>
      %308 = vector.broadcast %307 : vector<1x32xf32> to vector<2x32xf32>
      %309 = arith.addf %306, %308 : vector<2x32xf32>
      %310 = arith.truncf %309 : vector<2x32xf32> to vector<2x32xbf16>
      %c0_209 = arith.constant 0 : index
      %c0_210 = arith.constant 0 : index
      %311 = vector.load %arg18[%c0_209, %c0_210] : memref<32x32xbf16, #tpu.memory_space<vmem>>, vector<32x32xbf16>
      %cst_211 = arith.constant dense<0.000000e+00> : vector<2x32xf32>
      %312 = tpu.matmul %310, %311, %cst_211 {dimension_numbers = #tpu.dot_dimension_numbers<[1], [0], [0], [1], [0, 0, 1, 1], [], []>} : vector<2x32xbf16>, vector<32x32xbf16>, vector<2x32xf32> -> vector<2x32xf32>
      %c0_212 = arith.constant 0 : index
      %c0_213 = arith.constant 0 : index
      %313 = vector.load %arg19[%c0_212, %c0_213] : memref<2x32xf32, #tpu.memory_space<vmem>>, vector<2x32xf32>
      tpu.vector_store %arg19[%c0_212, %c0_213], %312 {strides = array<i32>} : memref<2x32xf32, #tpu.memory_space<vmem>>, vector<2x32xf32>,
    } else {
    }
    return
  }
  func.func @transform_0(%arg0: i32, %arg1: memref<2xi32, #tpu.memory_space<smem>>) -> (i32, i32, i32) {
    %c0_i32 = arith.constant 0 : i32
    %c0_i32_0 = arith.constant 0 : i32
    %c0_i32_1 = arith.constant 0 : i32
    %c0_i32_2 = arith.constant 0 : i32
    return %c0_i32, %c0_i32_0, %c0_i32_1 : i32, i32, i32
  }
  func.func @transform_1(%arg0: i32, %arg1: memref<2xi32, #tpu.memory_space<smem>>) -> (i32, i32) {
    %c0_i32 = arith.constant 0 : i32
    %c0_i32_0 = arith.constant 0 : i32
    %c0_i32_1 = arith.constant 0 : i32
    return %c0_i32, %c0_i32_0 : i32, i32
  }
  func.func @transform_2(%arg0: i32, %arg1: memref<2xi32, #tpu.memory_space<smem>>) -> (i32, i32, i32) {
    %c0_i32 = arith.constant 0 : i32
    %c0_i32_0 = arith.constant 0 : i32
    %c0_i32_1 = arith.constant 0 : i32
    return %arg0, %c0_i32, %c0_i32_0 : i32, i32, i32
  }
  func.func @transform_3(%arg0: i32, %arg1: memref<2xi32, #tpu.memory_space<smem>>) -> (i32, i32, i32) {
    %c0_i32 = arith.constant 0 : i32
    %c0_i32_0 = arith.constant 0 : i32
    %c0_i32_1 = arith.constant 0 : i32
    return %arg0, %c0_i32, %c0_i32_0 : i32, i32, i32
  }
  func.func @transform_4(%arg0: i32, %arg1: memref<2xi32, #tpu.memory_space<smem>>) -> (i32, i32, i32, i32, i32) {
    %c0_i32 = arith.constant 0 : i32
    %c0_i32_0 = arith.constant 0 : i32
    %c0_i32_1 = arith.constant 0 : i32
    %c0_i32_2 = arith.constant 0 : i32
    %c0_i32_3 = arith.constant 0 : i32
    return %arg0, %c0_i32, %c0_i32_0, %c0_i32_1, %c0_i32_2 : i32, i32, i32, i32, i32
  }
  func.func @transform_5(%arg0: i32, %arg1: memref<2xi32, #tpu.memory_space<smem>>) -> (i32, i32, i32, i32) {
    %c0_i32 = arith.constant 0 : i32
    %c0_i32_0 = arith.constant 0 : i32
    %c0_i32_1 = arith.constant 0 : i32
    %c0_i32_2 = arith.constant 0 : i32
    return %arg0, %c0_i32, %c0_i32_0, %c0_i32_1 : i32, i32, i32, i32
  }
  func.func @transform_6(%arg0: i32, %arg1: memref<2xi32, #tpu.memory_space<smem>>) -> (i32, i32, i32, i32) {
    %c0_i32 = arith.constant 0 : i32
    %c0_i32_0 = arith.constant 0 : i32
    %c0_i32_1 = arith.constant 0 : i32
    %c0_i32_2 = arith.constant 0 : i32
    return %arg0, %c0_i32, %c0_i32_0, %c0_i32_1 : i32, i32, i32, i32
  }
  func.func @transform_7(%arg0: i32, %arg1: memref<2xi32, #tpu.memory_space<smem>>) -> (i32, i32, i32) {
    %c0_i32 = arith.constant 0 : i32
    %c0_i32_0 = arith.constant 0 : i32
    %c0_i32_1 = arith.constant 0 : i32
    return %arg0, %c0_i32, %c0_i32_0 : i32, i32, i32
  }
  func.func @transform_8(%arg0: i32, %arg1: memref<2xi32, #tpu.memory_space<smem>>) -> (i32, i32, i32) {
    %c0_i32 = arith.constant 0 : i32
    %c0_i32_0 = arith.constant 0 : i32
    %c0_i32_1 = arith.constant 0 : i32
    return %arg0, %c0_i32, %c0_i32_0 : i32, i32, i32
  }
  func.func @transform_9(%arg0: i32, %arg1: memref<2xi32, #tpu.memory_space<smem>>) -> (i32, i32, i32) {
    %c0_i32 = arith.constant 0 : i32
    %c0_i32_0 = arith.constant 0 : i32
    %c0_i32_1 = arith.constant 0 : i32
    return %arg0, %c0_i32, %c0_i32_0 : i32, i32, i32
  }
  func.func @transform_10(%arg0: i32, %arg1: memref<2xi32, #tpu.memory_space<smem>>) -> (i32, i32, i32) {
    %c0_i32 = arith.constant 0 : i32
    %c0_i32_0 = arith.constant 0 : i32
    %c0_i32_1 = arith.constant 0 : i32
    return %arg0, %c0_i32, %c0_i32_0 : i32, i32, i32
  }
  func.func @transform_11(%arg0: i32, %arg1: memref<2xi32, #tpu.memory_space<smem>>) -> (i32, i32, i32) {
    %c0_i32 = arith.constant 0 : i32
    %c0_i32_0 = arith.constant 0 : i32
    %c0_i32_1 = arith.constant 0 : i32
    return %arg0, %c0_i32, %c0_i32_0 : i32, i32, i32
  }
  func.func @transform_12(%arg0: i32, %arg1: memref<2xi32, #tpu.memory_space<smem>>) -> (i32, i32, i32) {
    %c0_i32 = arith.constant 0 : i32
    %c0_i32_0 = arith.constant 0 : i32
    %c0_i32_1 = arith.constant 0 : i32
    return %arg0, %c0_i32, %c0_i32_0 : i32, i32, i32
  }
  func.func @transform_13(%arg0: i32, %arg1: memref<2xi32, #tpu.memory_space<smem>>) -> (i32, i32, i32) {
    %c0_i32 = arith.constant 0 : i32
    %c0_i32_0 = arith.constant 0 : i32
    %c0_i32_1 = arith.constant 0 : i32
    return %arg0, %c0_i32, %c0_i32_0 : i32, i32, i32
  }
  func.func @transform_14(%arg0: i32, %arg1: memref<2xi32, #tpu.memory_space<smem>>) -> (i32, i32) {
    %c0_i32 = arith.constant 0 : i32
    %c0_i32_0 = arith.constant 0 : i32
    %c0_i32_1 = arith.constant 0 : i32
    return %c0_i32, %c0_i32_0 : i32, i32
  }
  func.func @transform_15(%arg0: i32, %arg1: memref<2xi32, #tpu.memory_space<smem>>) -> (i32, i32) {
    %c0_i32 = arith.constant 0 : i32
    %c0_i32_0 = arith.constant 0 : i32
    %c0_i32_1 = arith.constant 0 : i32
    return %c0_i32, %c0_i32_0 : i32, i32
  }
  func.func @transform_16(%arg0: i32, %arg1: memref<2xi32, #tpu.memory_space<smem>>) -> (i32, i32) {
    %c0_i32 = arith.constant 0 : i32
    %c0_i32_0 = arith.constant 0 : i32
    %c0_i32_1 = arith.constant 0 : i32
    return %c0_i32, %c0_i32_0 : i32, i32
  }
  func.func @transform_17(%arg0: i32, %arg1: memref<2xi32, #tpu.memory_space<smem>>) -> (i32, i32) {
    %c0_i32 = arith.constant 0 : i32
    %c0_i32_0 = arith.constant 0 : i32
    %c0_i32_1 = arith.constant 0 : i32
    return %c0_i32, %c0_i32_0 : i32, i32
  }
}

</mosaic_0001>

<bundles_post_ra>
// kernel: tpu_custom_call.1
= control target key start
LH: loop header
LB: loop body
LE: loop exit
PB: predicated region body
PF: predicated region fallthrough
CT: control target
= control target key end

     0   :  { %s2654_s30 = smov [#allocation4]   ;;  %s3067_s0 = inlined_call_operand.vmem [shape: s32[2], index: 0, kind: input, shape index: {}]   ;;  %s3068_s1 = inlined_call_operand.vmem [shape: f32[2,8,32], index: 1, kind: input, shape index: {}]   ;;  %s3069_s2 = inlined_call_operand.vmem [shape: f32[8,32], index: 2, kind: input, shape index: {}]   ;;  %s3070_s3 = inlined_call_operand.vmem [shape: f32[2,1,32], index: 3, kind: input, shape index: {}]   ;;  %s3071_s4 = inlined_call_operand.vmem [shape: f32[2,1,32], index: 4, kind: input, shape index: {}]   ;;  %s3072_s5 = inlined_call_operand.vmem [shape: bf16[2,3,4,32,8], index: 5, kind: input, shape index: {}]   ;;  %s3073_s6 = inlined_call_operand.vmem [shape: f32[2,3,4,8], index: 6, kind: input, shape index: {}]   ;;  %s3074_s7 = inlined_call_operand.vmem [shape: bf16[2,4,8,32], index: 7, kind: input, shape index: {}]   ;;  %s3075_s8 = inlined_call_operand.vmem [shape: f32[2,1,32], index: 8, kind: input, shape index: {}]   ;;  %s3076_s9 = inlined_call_operand.vmem [shape: f32[2,1,32], index: 9, kind: input, shape index: {}]   ;;  %s3077_s10 = inlined_call_operand.vmem [shape: f32[2,1,32], index: 10, kind: input, shape index: {}]   ;;  %s3078_s11 = inlined_call_operand.vmem [shape: bf16[2,32,128], index: 11, kind: input, shape index: {}]   ;;  %s3079_s12 = inlined_call_operand.vmem [shape: f32[2,1,128], index: 12, kind: input, shape index: {}]   ;;  %s3080_s13 = inlined_call_operand.vmem [shape: bf16[2,128,32], index: 13, kind: input, shape index: {}]   ;;  %s3081_s14 = inlined_call_operand.vmem [shape: f32[2,1,32], index: 14, kind: input, shape index: {}]   ;;  %s3082_s15 = inlined_call_operand.vmem [shape: f32[1,32], index: 15, kind: input, shape index: {}]   ;;  %s3083_s16 = inlined_call_operand.vmem [shape: f32[1,32], index: 16, kind: input, shape index: {}]   ;;  %s3084_s17 = inlined_call_operand.vmem [shape: bf16[32,32], index: 17, kind: input, shape index: {}]   ;;  %s3085_s18 = inlined_call_operand.hbm [shape: f32[2,32], index: 18, kind: output, shape index: {}]  }
   0x1   :  { %3089 = sst [smem:[#allocation10_spill]] %s3067_s0 }
   0x2   :  { %3090 = sst [smem:[#allocation11_spill]] %s3068_s1 }
   0x3   :  { %3091 = sst [smem:[#allocation12_spill]] %s3069_s2 }
   0x4   :  { %3092 = sst [smem:[#allocation13_spill]] %s3072_s5 }
   0x5   :  { %3093 = sst [smem:[#allocation14_spill]] %s3073_s6 }
   0x6   :  { %3094 = sst [smem:[#allocation15_spill]] %s3074_s7 }
   0x7   :  { %3095 = sst [smem:[#allocation16_spill]] %s3079_s12 }
   0x8   :  { %3096 = sst [smem:[#allocation17_spill]] %s3082_s15 }
   0x9   :  { %3097 = sst [smem:[#allocation18_spill]] %s3083_s16 }
   0xa   :  { %3098 = sst [smem:[#allocation19_spill]] %s3084_s17 }
   0xb   :  { %3099 = sst [smem:[#allocation20_spill]] %s3085_s18 }
   0xc   :  { %s3100_s29 = sld [smem:[#allocation10_spill]] }
  0x12   :  { %s24_s12 = sshll.u32 %s3100_s29, 4  ;;  %s25_s12 = int_to_ptr.vmem [resolvable:$true] %s24_s12 }
  0x13   :  { %27 = dma.vmem_to_smem %s25_s12, 16, %s2654_s30, [#allocation3] }
  0x14   :  { %2644 = dma.done.wait [#allocation3], 16 }
  0x15   :  { %2645 = vsyncadd [#allocation3], 4294967280 }
  0x16   :  { %30 = sfence }
  0x17   :  { %31 = vsyncpa [#allocation6], 0  ;;  %s2756_s0 = smov 0  }
  0x18 LB: > { %3101 = sst [smem:[#allocation9_spill]] %s2652_s0  ;;  %s2762_s19 = sadd.s32 4294967295, %s2652_s0   ;;  %s2652_s0 = sphi %s2756_s0, %s37_s0  }
  0x19   : > { %p2216_p0 = scmp.ge.s32.totalorder %s2652_s0, 1  ;;  %p588_p1 = scmp.lt.s32.totalorder %s2652_s0, 3 }
  0x1b   : > { %p589_p2 = pnand %p2216_p0, %p588_p1 }
  0x1c   : > { %p676_p3 = scmp.lt.s32.totalorder (!%p589_p2), %s2762_s19, 1  ;;  %s3102_s7 = sld [smem:[#allocation15_spill]] (!%p589_p2) }
  0x1d   : > { %592 = sbr.rel (%p589_p2) target bundleno = 2213 (0x8a5), region = 88  ;;  %s3103_s5 = sld [smem:[#allocation13_spill]] (!%p589_p2) }
  0x1e   : > { %s3104_s6 = sld [smem:[#allocation14_spill]] (!%p589_p2)  ;;  %p2225_p4 = scmp.ne.s32.totalorder (!%p589_p2), %s2762_s19, 0 }
  0x1f   : > { %s3105_s21 = sld [smem:[#allocation16_spill]] (!%p589_p2) }
  0x22   : > { %s2768_s12 = scalar_select %p676_p3, %s2762_s19, 1 }
  0x23   : > { %s3106_s30 = sld [smem:[#allocation11_spill]] (!%p2225_p4) }
  0x24   : > { %s2507_s24 = smul.u32 192, %s2768_s12  ;;  %s2468_s25 = sshll.u32 %s2768_s12, 4 }
  0x25   : > { %s2508_s26 = smul.u32 12, %s2768_s12  ;;  %s2784_s29 = scalar_lea.vmem %s3102_s7, %s2468_s25 }
  0x26   : > { %s2789_s20 = scalar_lea.vmem %s3103_s5, %s2507_s24  ;;  %s702_s27 = scalar_lea.vmem %s3076_s9, %s2768_s12 }
  0x27   : > { %s2798_s2 = scalar_lea.vmem %s3104_s6, %s2508_s26  ;;  %s705_s17 = scalar_lea.vmem %s3077_s10, %s2768_s12 }
  0x28   : > { %s2811_s1 = scalar_lea.vmem %s3078_s11, %s2468_s25  ;;  %s713_s5 = scalar_lea.vmem %s3105_s21, %s2768_s12 }
  0x29   : > { %s2470_s16 = sshll.u32 %s2768_s12, 6  ;;  %s721_s7 = scalar_lea.vmem %s3081_s14, %s2768_s12 }
  0x2a   : > { %s2821_s6 = scalar_lea.vmem %s3080_s13, %s2470_s16  ;;  %726 = sbr.rel (%p2225_p4) target bundleno = 54 (0x36), region = 92 }
  0x2b   : > { %s3107_s21 = sld [smem:[#allocation12_spill]] (!%p2225_p4) }
  0x2f   : > { %v727_v0 = vld [vmem:[%s3106_s30] sm:$0xff]  ;;  %vm732_vm0 = vcmask 261120   ;;  %v728_v2 = vld [vmem:[%s3106_s30 + $0x8] sm:$0xff] }
  0x31   : > { %v729_v1 = vld [vmem:[%s3107_s21] sm:$0xff] }
  0x32   : > { %v730_v3 = vadd.f32 %v729_v1, %v727_v0  ;;  %v731_v4 = vadd.f32 %v729_v1, %v728_v2 }
  0x34   : > { %733 = vst.msk [vmem:[#allocation2] sm:$0xff] %vm732_vm0, %v730_v3 }
  0x35   : > { %734 = vst.msk [vmem:[#allocation2 + $0x8] sm:$0xff] %vm732_vm0, %v731_v4 }
  0x36 PF: > { %vm739_vm1 = vcmask 261120   ;;  %v2655_v9 = vmov 32.0   ;;  %v2472_v26 = vld [vmem:[%s2789_s20 + $0x8] sm:$0xff]  ;;  %v2478_v28 = vld [vmem:[%s2789_s20 + $0x18] sm:$0xff]  ;;  %v2471_v32 = vld [vmem:[%s2789_s20] sm:$0xff]  ;;  %s3108_s15 = scalar_lea.vmem %s3070_s3, %s2768_s12  ;;  %s3109_s25 = scalar_lea.vmem %s3071_s4, %s2768_s12  ;;  %vm1240_vm9 = vcmask 64512  }
  0x37   : > { %2546 = vrcp.f32 %v2655_v9  ;;  %v2474_v27 = vld [vmem:[%s2789_s20 + $0x48] sm:$0xff]  ;;  %v2482_v29 = vld [vmem:[%s2789_s20 + $0x98] sm:$0xff]  ;;  %829 = vmatpush.bf16.msra.mxu0 %v2472_v26  ;;  %932 = vmatpush.bf16.msra.mxu3 %v2478_v28  ;;  %v2473_v33 = vld [vmem:[%s2789_s20 + $0x40] sm:$0xff]  ;;  %vm1492_vm10 = vcmask 1043456   ;;  %p2452_p5 = scmp.ne.s32.totalorder %s2762_s19, 1 }
  0x38   : > { %863 = vmatpush.bf16.msra.mxu2 %v2474_v27  ;;  %998 = vmatpush.bf16.msra.mxu1 %v2482_v29  ;;  %v2477_v34 = vld [vmem:[%s2789_s20 + $0x10] sm:$0xff]  ;;  %v2476_v38 = vld [vmem:[%s2789_s20 + $0x88] sm:$0xff]  ;;  %v2480_v39 = vld [vmem:[%s2789_s20 + $0x58] sm:$0xff]  ;;  %s1972_s26 = sld [smem:[#allocation4]] (!%p2452_p5) }
  0x39   : > { %v2481_v36 = vld [vmem:[%s2789_s20 + $0x90] sm:$0xff]  ;;  %v2486_v40 = vld [vmem:[%s2789_s20 + $0x68] sm:$0xff]  ;;  %v2490_v42 = vld [vmem:[%s2789_s20 + $0x38] sm:$0xff]  ;;  %s2453_s16 = sld [smem:[#allocation4 + $0x1]] (!%p2452_p5) }
  0x3a   : > { %v2475_v43 = vld [vmem:[%s2789_s20 + $0x80] sm:$0xff]  ;;  %v2479_v44 = vld [vmem:[%s2789_s20 + $0x50] sm:$0xff]  ;;  %v2484_v9 = vld [vmem:[%s2789_s20 + $0x28] sm:$0xff]  ;;  %s3112_s23 = sld [smem:[#allocation19_spill]] (!%p2452_p5) }
  0x3b   : > { %v2837_v5 = vld [vmem:[#allocation2] sm:$0xff]  ;;  %830 = vmatpush.bf16.msra.mxu0 %v2471_v32  ;;  %933 = vmatpush.bf16.msra.mxu3 %v2477_v34  ;;  %v2489_v48 = vld [vmem:[%s2789_s20 + $0x30] sm:$0xff]  ;;  %s3114_s18 = sld [smem:[#allocation18_spill]] (!%p2452_p5) }
  0x3c   : > { %v740_v6 = vsel %vm739_vm1, %v2837_v5, 0.0  ;;  %v2841_v7 = vld [vmem:[#allocation2 + $0x8] sm:$0xff]  ;;  %864 = vmatpush.bf16.msra.mxu2 %v2473_v33  ;;  %999 = vmatpush.bf16.msra.mxu1 %v2481_v36  ;;  %v2485_v47 = vld [vmem:[%s2789_s20 + $0x60] sm:$0xff] }
  0x3d   : > { %741 = vadd.xlane.f32.xlu0 %v740_v6  ;;  %v743_v8 = vsel %vm739_vm1, %v2841_v7, 0.0  ;;  %v2547_v10 = vpop.eup %2546  ;;  %v2527_v60 = vld [vmem:[%s3108_s15] ss:$0 sm:$0xff]  ;;  %v2533_v29 = vld [vmem:[%s2798_s2 + $0x5] ss:$0 sm:$0xff] }
  0x3e   : > { %v747_v11 = vmul.f32 32.0, %v2547_v10  ;;  %vm751_vm2 = vweird.f32 %v2547_v10  ;;  %v2528_v0 = vld [vmem:[%s3109_s25] ss:$0 sm:$0xff]  ;;  %s1973_s22 = scalar_lea.vmem (!%p2452_p5), [#allocation2], %s1972_s26 }
  0x3f   : > { %965 = vmatpush.bf16.msrb.mxu0 %v2480_v39  ;;  %1066 = vmatpush.bf16.msrb.mxu3 %v2486_v40 }
  0x40   : > { %v748_v12 = vsub.f32 1.0, %v747_v11  ;;  %897 = vmatpush.bf16.msrb.mxu2 %v2476_v38  ;;  %1134 = vmatpush.bf16.msrb.mxu1 %v2490_v42  ;;  %v2494_v11 = vld [vmem:[%s2789_s20 + $0xb8] sm:$0xff]  ;;  %v2535_v42 = vld [vmem:[%s2798_s2 + $0x8] ss:$0 sm:$0xff] }
  0x42   : > { %v749_v13 = vmul.f32 %v2547_v10, %v748_v12  ;;  %v2483_v12 = vld [vmem:[%s2789_s20 + $0x20] sm:$0xff] }
  0x43   : > { %966 = vmatpush.bf16.msrb.mxu0 %v2479_v44  ;;  %1067 = vmatpush.bf16.msrb.mxu3 %v2485_v47 }
  0x44   : > { %v750_v14 = vadd.f32 %v2547_v10, %v749_v13  ;;  %898 = vmatpush.bf16.msrb.mxu2 %v2475_v43  ;;  %1135 = vmatpush.bf16.msrb.mxu1 %v2489_v48  ;;  %v2487_v13 = vld [vmem:[%s2789_s20 + $0xa0] sm:$0xff] }
  0x45   : > { %744 = vadd.xlane.f32.xlu0 %v743_v8  ;;  %v2536_v43 = vld [vmem:[%s2798_s2 + $0x6] ss:$0 sm:$0xff] }
  0x46   : > { %v2845_v15 = vsel %vm751_vm2, %v2547_v10, %v750_v14  ;;  %v2488_v10 = vld [vmem:[%s2789_s20 + $0xa8] sm:$0xff]  ;;  %v2493_v14 = vld [vmem:[%s2789_s20 + $0xb0] sm:$0xff] }
  0xb0   : > { %v742_v16 = vpop.xlane.xlu0 %741 }
  0xb1   : > { %v753_v17 = vmul.f32 %v2845_v15, %v742_v16  ;;  %v2492_v16 = vld [vmem:[%s2789_s20 + $0x78] sm:$0xff] }
  0xb3   : > { %v2849_v18 = vsub.f32 %v2837_v5, %v753_v17  ;;  %v2491_v17 = vld [vmem:[%s2789_s20 + $0x70] sm:$0xff] }
  0xb5   : > { %v757_v19 = vmul.f32 %v2849_v18, %v2849_v18 }
  0xb7   : > { %v759_v20 = vsel %vm739_vm1, %v757_v19, 0.0  ;;  %v2531_v19 = vld [vmem:[%s2798_s2 + $0x4] ss:$0 sm:$0xff] }
  0xb8   : > { %760 = vadd.xlane.f32.xlu1 %v759_v20  ;;  %v745_v21 = vpop.xlane.xlu0 %744  ;;  %v2529_v20 = vld [vmem:[%s2798_s2] ss:$0 sm:$0xff] }
  0xb9   : > { %v754_v22 = vmul.f32 %v2845_v15, %v745_v21 }
  0xbb   : > { %v2856_v23 = vsub.f32 %v2841_v7, %v754_v22 }
  0xbd   : > { %v758_v24 = vmul.f32 %v2856_v23, %v2856_v23 }
  0xbf   : > { %v762_v25 = vsel %vm739_vm1, %v758_v24, 0.0 }
  0xc0   : > { %763 = vadd.xlane.f32.xlu1 %v762_v25 }
 0x12b   : > { %v761_v30 = vpop.xlane.xlu1 %760 }
 0x12c   : > { %v765_v31 = vmul.f32 %v761_v30, %v2845_v15 }
 0x12e   : > { %v767_v35 = vadd.f32 1e-05, %v765_v31  ;;  %v2532_v31 = vld [vmem:[%s2798_s2 + $0x1] ss:$0 sm:$0xff] }
 0x130   : > { %2548 = vrsqrt.f32 %v767_v35  ;;  %vm775_vm4 = vweird.f32 %v767_v35 }
 0x133   : > { %v764_v37 = vpop.xlane.xlu1 %763 }
 0x134   : > { %v766_v41 = vmul.f32 %v764_v37, %v2845_v15 }
 0x136   : > { %v2549_v45 = vpop.eup %2548  ;;  %v768_v46 = vadd.f32 1e-05, %v766_v41 }
 0x137   : > { %v770_v49 = vmul.f32 %v2549_v45, %v767_v35  ;;  %vm776_vm3 = vweird.f32 %v2549_v45 }
 0x138   : > { %2550 = vrsqrt.f32 %v768_v46  ;;  %vm777_vm5 = vmor %vm775_vm4, %vm776_vm3  ;;  %vm785_vm7 = vweird.f32 %v768_v46 }
 0x139   : > { %v771_v50 = vmul.f32 %v2549_v45, %v770_v49 }
 0x13b   : > { %v772_v51 = vmul.f32 0.5, %v771_v50 }
 0x13d   : > { %v773_v52 = vsub.f32 1.5, %v772_v51 }
 0x13e   : > { %v2551_v53 = vpop.eup %2550 }
 0x13f   : > { %v774_v54 = vmul.f32 %v2549_v45, %v773_v52  ;;  %v780_v55 = vmul.f32 %v2551_v53, %v768_v46  ;;  %vm786_vm6 = vweird.f32 %v2551_v53 }
 0x140   : > { %vm787_vm8 = vmor %vm785_vm7, %vm786_vm6 }
 0x141   : > { %v781_v56 = vmul.f32 %v2551_v53, %v780_v55  ;;  %v778_v57 = vsel %vm777_vm5, %v2549_v45, %v774_v54 }
 0x142   : > { %v789_v61 = vmul.f32 %v778_v57, %v2849_v18 }
 0x143   : > { %v782_v58 = vmul.f32 0.5, %v781_v56 }
 0x144   : > { %v794_v1 = vmul.f32 %v2527_v60, %v789_v61 }
 0x145   : > { %v783_v59 = vsub.f32 1.5, %v782_v58 }
 0x146   : > { %v799_v4 = vadd.f32 %v2528_v0, %v794_v1 }
 0x147   : > { %v784_v62 = vmul.f32 %v2551_v53, %v783_v59 }
 0x149   : > { %v788_v63 = vsel %vm787_vm8, %v2551_v53, %v784_v62 }
 0x14a   : > { %v790_v2 = vmul.f32 %v788_v63, %v2856_v23 }
 0x14c   : > { %v795_v3 = vmul.f32 %v2527_v60, %v790_v2 }
 0x14e   : > { %v800_v6 = vadd.f32 %v2528_v0, %v795_v3 }
 0x150   : > { %v801_v8 = vpack.c.bf16 %v800_v6, %v799_v4 }
 0x152   : > { %2234 = vmatmul.msk.bf16.vlgmr.msra.gmra.mxu0 %vm739_vm1, %v801_v8  ;;  %2248 = vmatmul.msk.bf16.vlgmr.msra.gmra.mxu2 %vm739_vm1, %v801_v8 }
 0x153   : > { %2275 = vmatmul.msk.bf16.vlgmr.msra.gmra.mxu3 %vm739_vm1, %v801_v8  ;;  %2303 = vmatmul.msk.bf16.vlgmr.msra.gmra.mxu1 %vm739_vm1, %v801_v8 }
 0x154   : > { %1033 = vmatpush.bf16.msra.mxu2 %v2484_v9  ;;  %1099 = vmatpush.bf16.msra.mxu0 %v2488_v10 }
 0x155   : > { %1200 = vmatpush.bf16.msra.mxu3 %v2494_v11 }
 0x158   : > { %1034 = vmatpush.bf16.msra.mxu2 %v2483_v12  ;;  %1100 = vmatpush.bf16.msra.mxu0 %v2487_v13  ;;  %v2538_v12 = vld [vmem:[%s2798_s2 + $0x2] ss:$0 sm:$0xff] }
 0x159   : > { %1201 = vmatpush.bf16.msra.mxu3 %v2493_v14 }
 0x162   : > { %2262 = vmatmul.msk.bf16.vlgmr.msrb.gmra.mxu2 %vm739_vm1, %v801_v8  ;;  %2289 = vmatmul.msk.bf16.vlgmr.msrb.gmra.mxu0 %vm739_vm1, %v801_v8 }
 0x163   : > { %2330 = vmatmul.msk.bf16.vlgmr.msrb.gmra.mxu3 %vm739_vm1, %v801_v8  ;;  %2357 = vmatmul.msk.bf16.vlgmr.msrb.gmra.mxu1 %vm739_vm1, %v801_v8 }
 0x164   : > { %1167 = vmatpush.bf16.msrb.mxu2 %v2492_v16 }
 0x168   : > { %1168 = vmatpush.bf16.msrb.mxu2 %v2491_v17 }
 0x172   : > { %2316 = vmatmul.msk.bf16.vlgmr.msra.gmra.mxu2 %vm739_vm1, %v801_v8  ;;  %2344 = vmatmul.msk.bf16.vlgmr.msra.gmra.mxu0 %vm739_vm1, %v801_v8 }
 0x173   : > { %2385 = vmatmul.msk.bf16.vlgmr.msra.gmra.mxu3 %vm739_vm1, %v801_v8 }
 0x182   : > { %2371 = vmatmul.msk.bf16.vlgmr.msrb.gmra.mxu2 %vm739_vm1, %v801_v8  ;;  %v2537_v8 = vld [vmem:[%s2798_s2 + $0xa] ss:$0 sm:$0xff] }
 0x1cf   : > { %v832_v18 = vpop.f32.mrf.mxu0 }
 0x1d0   : > { %v833_v25 = vadd.f32 %v2529_v20, %v832_v18  ;;  %v1001_v2 = vpop.f32.mrf.mxu1 }
 0x1d2   : > { %v905_v28 = vmul.f32 0.35355338, %v833_v25 }
 0x1d4   : > { %v1210_v35 = vpack.c.bf16 %v905_v28, %v905_v28 }
 0x1d5   : > { %v866_v21 = vpop.f32.mrf.mxu2 }
 0x1d6   : > { %v867_v22 = vadd.f32 %v2531_v19, %v866_v21  ;;  %v935_v23 = vpop.f32.mrf.mxu3 }
 0x1d7   : > { %v834_v24 = vpop.f32.mrf.mxu0  ;;  %v936_v39 = vadd.f32 %v2532_v31, %v935_v23 }
 0x1d8   : > { %v1218_v26 = vpack.c.bf16 %v867_v22, %v867_v22  ;;  %v835_v36 = vadd.f32 %v2529_v20, %v834_v24  ;;  %v1003_v20 = vpop.f32.mrf.mxu1 }
 0x1d9   : > { %v1006_v47 = vmul.f32 0.35355338, %v936_v39 }
 0x1da   : > { %v1245_v27 = vsel %vm1240_vm9, %v1218_v26, 0  ;;  %v906_v44 = vmul.f32 0.35355338, %v835_v36 }
 0x1db   : > { %1254 = vmatpush.bf16.xpose.msrb.mxu0 %v1245_v27  ;;  %v1212_v56 = vpack.c.bf16 %v1006_v47, %v1006_v47  ;;  %v2530_v27 = vld [vmem:[%s2798_s2 + $0x9] ss:$0 sm:$0xff] }
 0x1dc   : > { %v1211_v52 = vpack.c.bf16 %v906_v44, %v906_v44 }
 0x1dd   : > { %v868_v30 = vpop.f32.mrf.mxu2 }
 0x1de   : > { %v869_v32 = vadd.f32 %v2531_v19, %v868_v30  ;;  %v937_v33 = vpop.f32.mrf.mxu3 }
 0x1df   : > { %v968_v34 = vpop.f32.mrf.mxu0  ;;  %v938_v57 = vadd.f32 %v2532_v31, %v937_v33  ;;  %v2540_v31 = vld [vmem:[%s2798_s2 + $0x7] ss:$0 sm:$0xff] }
 0x1e0   : > { %v1219_v37 = vpack.c.bf16 %v869_v32, %v869_v32  ;;  %v969_v38 = vadd.f32 %v2533_v29, %v968_v34  ;;  %v1002_v32 = vadd.f32 %v2530_v27, %v1001_v2  ;;  %v1137_v33 = vpop.f32.mrf.mxu1  ;;  %v2534_v34 = vld [vmem:[%s2798_s2 + $0x3] ss:$0 sm:$0xff] }
 0x1e1   : > { %v1007_v63 = vmul.f32 0.35355338, %v938_v57 }
 0x1e2   : > { %v1264_v40 = vsel %vm1240_vm9, %v1219_v37, 0  ;;  %v1220_v41 = vpack.c.bf16 %v969_v38, %v969_v38  ;;  %2386 = vmatmul.msk.bf16.vlgmr.msrb.gmra.mxu0 %vm1240_vm9, %v1210_v35  ;;  %v2539_v38 = vld [vmem:[%s2798_s2 + $0xb] ss:$0 sm:$0xff]  ;;  %s3110_s2 = scalar_lea.vmem %s3075_s8, %s2768_s12  ;;  %s2128_s12 = scalar_lea.vmem (!%p2452_p5), [#allocation2], %s2453_s16 }
 0x1e3   : > { %1273 = vmatpush.bf16.xpose.msra.mxu1 %v1264_v40  ;;  %v1213_v10 = vpack.c.bf16 %v1007_v63, %v1007_v63  ;;  %v1228_v40 = vpack.c.bf16 %v1002_v32, %v1002_v32 }
 0x1e4   : > { %v1283_v45 = vsel %vm1240_vm9, %v1220_v41, 0  ;;  %v1138_v41 = vadd.f32 %v2534_v34, %v1137_v33 }
 0x1e5   : > { %v900_v46 = vpop.f32.mrf.mxu2  ;;  %1292 = vmatpush.bf16.xpose.msra.mxu2 %v1283_v45  ;;  %v1532_v45 = vsel %vm1492_vm10, %v1228_v40, 0 }
 0x1e6   : > { %v901_v48 = vadd.f32 %v2535_v42, %v900_v46  ;;  %v1069_v49 = vpop.f32.mrf.mxu3  ;;  %v1004_v46 = vadd.f32 %v2530_v27, %v1003_v20  ;;  %v1208_v47 = vmul.f32 0.35355338, %v1138_v41 }
 0x1e7   : > { %v1070_v50 = vadd.f32 %v2536_v43, %v1069_v49  ;;  %v970_v51 = vpop.f32.mrf.mxu0 }
 0x1e8   : > { %v1226_v53 = vpack.c.bf16 %v901_v48, %v901_v48  ;;  %v971_v54 = vadd.f32 %v2533_v29, %v970_v51  ;;  %v1139_v48 = vpop.f32.mrf.mxu1 }
 0x1e9   : > { %v1222_v55 = vpack.c.bf16 %v1070_v50, %v1070_v50 }
 0x1ea   : > { %v1494_v58 = vsel %vm1492_vm10, %v1226_v53, 0  ;;  %v1221_v59 = vpack.c.bf16 %v971_v54, %v971_v54  ;;  %2387 = vmatmul.msk.bf16.vlgmr.msra.gmra.mxu1 %vm1240_vm9, %v1211_v52  ;;  %v1229_v52 = vpack.c.bf16 %v1004_v46, %v1004_v46  ;;  %v1216_v54 = vpack.c.bf16 %v1208_v47, %v1208_v47 }
 0x1eb   : > { %v1321_v60 = vsel %vm1240_vm9, %v1222_v55, 0  ;;  %v1140_v55 = vadd.f32 %v2534_v34, %v1139_v48 }
 0x1ec   : > { %v1302_v61 = vsel %vm1240_vm9, %v1221_v59, 0  ;;  %1330 = vmatpush.bf16.xpose.msra.mxu0 %v1321_v60  ;;  %2388 = vmatmul.msk.bf16.vlgmr.msra.gmra.mxu2 %vm1240_vm9, %v1212_v56  ;;  %v1551_v60 = vsel %vm1492_vm10, %v1229_v52, 0 }
 0x1ed   : > { %v902_v62 = vpop.f32.mrf.mxu2  ;;  %1311 = vmatpush.bf16.xpose.msrb.mxu3 %v1302_v61  ;;  %v1209_v61 = vmul.f32 0.35355338, %v1140_v55 }
 0x1ee   : > { %v903_v0 = vadd.f32 %v2535_v42, %v902_v62  ;;  %v1071_v1 = vpop.f32.mrf.mxu3 }
 0x1ef   : > { %v1072_v3 = vadd.f32 %v2536_v43, %v1071_v1  ;;  %v1102_v4 = vpop.f32.mrf.mxu0  ;;  %v1217_v63 = vpack.c.bf16 %v1209_v61, %v1209_v61  ;;  %v1234_v1 = vlaneseq }
 0x1f0   : > { %v1227_v6 = vpack.c.bf16 %v903_v0, %v903_v0  ;;  %v1103_v14 = vadd.f32 %v2537_v8, %v1102_v4  ;;  %v2656_v4 = vmov -1e+09  }
 0x1f1   : > { %v1223_v9 = vpack.c.bf16 %v1072_v3, %v1072_v3  ;;  %v1235_v2 = vshrl.u32 %v1234_v1, 7  ;;  %v1237_v3 = vand.u32 127, %v1234_v1 }
 0x1f2   : > { %v1513_v11 = vsel %vm1492_vm10, %v1227_v6, 0  ;;  %v1230_v18 = vpack.c.bf16 %v1103_v14, %v1103_v14 }
 0x1f3   : > { %v1340_v13 = vsel %vm1240_vm9, %v1223_v9, 0  ;;  %vm1238_vm11 = vcmp.ge.s32.totalorder %v1235_v2, %v1237_v3 }
 0x1f4   : > { %1503 = vmatpush.bf16.msrb.mxu0 %v1494_v58  ;;  %1349 = vmatpush.bf16.xpose.msrb.mxu1 %v1340_v13  ;;  %v1570_v23 = vsel %vm1492_vm10, %v1230_v18, 0  ;;  %v1239_v6 = vsel %vm1238_vm11, 0.0, %v2656_v4 }
 0x1f5   : > { %2389 = vmatmul.msk.bf16.vlgmr.msrb.gmra.mxu3 %vm1240_vm9, %v1213_v10  ;;  %v1036_v16 = vpop.f32.mrf.mxu2 }
 0x1f6   : > { %v1037_v17 = vadd.f32 %v2538_v12, %v1036_v16  ;;  %v1203_v36 = vpop.f32.mrf.mxu3 }
 0x1f7   : > { %v1104_v21 = vpop.f32.mrf.mxu0  ;;  %v1204_v43 = vadd.f32 %v2539_v38, %v1203_v36 }
 0x1f8   : > { %v1107_v19 = vmul.f32 0.35355338, %v1037_v17  ;;  %v1105_v24 = vadd.f32 %v2537_v8, %v1104_v21 }
 0x1f9   : > { %v1232_v50 = vpack.c.bf16 %v1204_v43, %v1204_v43 }
 0x1fa   : > { %v1214_v22 = vpack.c.bf16 %v1107_v19, %v1107_v19  ;;  %v1231_v28 = vpack.c.bf16 %v1105_v24, %v1105_v24 }
 0x1fb   : > { %v1608_v57 = vsel %vm1492_vm10, %v1232_v50, 0 }
 0x1fc   : > { %1522 = vmatpush.bf16.msra.mxu1 %v1513_v11  ;;  %2390 = vmatmul.msk.bf16.vlgmr.msra.gmra.mxu0 %vm1240_vm9, %v1214_v22  ;;  %v1589_v35 = vsel %vm1492_vm10, %v1231_v28, 0 }
 0x1fd   : > { %1579 = vmatpush.bf16.msra.mxu0 %v1570_v23  ;;  %v1038_v25 = vpop.f32.mrf.mxu2 }
 0x1fe   : > { %v1039_v26 = vadd.f32 %v2538_v12, %v1038_v25  ;;  %v1205_v53 = vpop.f32.mrf.mxu3 }
 0x1ff   : > { %v1206_v58 = vadd.f32 %v2539_v38, %v1205_v53 }
 0x200   : > { %v1108_v29 = vmul.f32 0.35355338, %v1039_v26 }
 0x201   : > { %v1233_v62 = vpack.c.bf16 %v1206_v58, %v1206_v58 }
 0x202   : > { %v1215_v30 = vpack.c.bf16 %v1108_v29, %v1108_v29 }
 0x203   : > { %v1627_v0 = vsel %vm1492_vm10, %v1233_v62, 0 }
 0x204   : > { %2391 = vmatmul.msk.bf16.vlgmr.msrb.gmra.mxu1 %vm1240_vm9, %v1215_v30 }
 0x205   : > { %1598 = vmatpush.bf16.msrb.mxu1 %v1589_v35  ;;  %v1170_v37 = vpop.f32.mrf.mxu2 }
 0x206   : > { %v1171_v39 = vadd.f32 %v2540_v31, %v1170_v37 }
 0x208   : > { %v1224_v42 = vpack.c.bf16 %v1171_v39, %v1171_v39 }
 0x20a   : > { %v1359_v44 = vsel %vm1240_vm9, %v1224_v42, 0 }
 0x20b   : > { %1368 = vmatpush.bf16.xpose.msrb.mxu2 %v1359_v44 }
 0x20d   : > { %v1172_v49 = vpop.f32.mrf.mxu2 }
 0x20e   : > { %v1173_v51 = vadd.f32 %v2540_v31, %v1172_v49 }
 0x210   : > { %v1225_v56 = vpack.c.bf16 %v1173_v51, %v1173_v51 }
 0x212   : > { %v1378_v59 = vsel %vm1240_vm9, %v1225_v56, 0  ;;  %2392 = vmatmul.msk.bf16.vlgmr.msrb.gmra.mxu2 %vm1240_vm9, %v1216_v54 }
 0x213   : > { %1541 = vmatpush.bf16.msra.mxu2 %v1532_v45  ;;  %1387 = vmatpush.bf16.xpose.msra.mxu3 %v1378_v59 }
 0x217   : > { %1617 = vmatpush.bf16.msrb.mxu2 %v1608_v57 }
 0x21a   : > { %2393 = vmatmul.msk.bf16.vlgmr.msra.gmra.mxu3 %vm1240_vm9, %v1217_v63 }
 0x21b   : > { %1560 = vmatpush.bf16.msrb.mxu3 %v1551_v60 }
 0x21f   : > { %1636 = vmatpush.bf16.msra.mxu3 %v1627_v0 }
 0x25f   : > { %v1256_v8 = vpop.f32.mrf.mxu0 }
 0x260   : > { %v1257_v9 = vadd.f32 %v1256_v8, %v1239_v6 }
 0x262   : > { %v1393_v10 = vsel %vm1240_vm9, %v1257_v9, -inf }
 0x263   : > { %1394 = vmax.xlane.f32.xlu0 %v1393_v10 }
 0x267   : > { %v1258_v11 = vpop.f32.mrf.mxu0  ;;  %v1275_v12 = vpop.f32.mrf.mxu1 }
 0x268   : > { %v1276_v13 = vadd.f32 %v1275_v12, %v1239_v6 }
 0x26a   : > { %v1396_v14 = vsel %vm1240_vm9, %v1276_v13, -inf }
 0x26b   : > { %1397 = vmax.xlane.f32.xlu1 %v1396_v14 }
 0x26f   : > { %v1277_v16 = vpop.f32.mrf.mxu1  ;;  %v1294_v17 = vpop.f32.mrf.mxu2 }
 0x270   : > { %v1295_v18 = vadd.f32 %v1294_v17, %v1239_v6 }
 0x272   : > { %v1399_v19 = vsel %vm1240_vm9, %v1295_v18, -inf }
 0x273   : > { %1400 = vmax.xlane.f32.xlu2 %v1399_v19 }
 0x277   : > { %v1296_v20 = vpop.f32.mrf.mxu2 }
 0x278   : > { %v1313_v21 = vpop.f32.mrf.mxu3 }
 0x279   : > { %v1314_v22 = vadd.f32 %v1313_v21, %v1239_v6  ;;  %v1332_v23 = vpop.f32.mrf.mxu0 }
 0x27a   : > { %v1333_v24 = vadd.f32 %v1332_v23, %v1239_v6 }
 0x27b   : > { %v1402_v25 = vsel %vm1240_vm9, %v1314_v22, -inf }
 0x27c   : > { %1403 = vmax.xlane.f32.xlu2 %v1402_v25  ;;  %v1405_v26 = vsel %vm1240_vm9, %v1333_v24, -inf }
 0x27d   : > { %1406 = vmax.xlane.f32.xlu1 %v1405_v26 }
 0x280   : > { %v1315_v27 = vpop.f32.mrf.mxu3 }
 0x281   : > { %v1334_v28 = vpop.f32.mrf.mxu0  ;;  %v1351_v29 = vpop.f32.mrf.mxu1 }
 0x282   : > { %v1352_v34 = vadd.f32 %v1351_v29, %v1239_v6 }
 0x284   : > { %v1408_v38 = vsel %vm1240_vm9, %v1352_v34, -inf }
 0x289   : > { %v1353_v30 = vpop.f32.mrf.mxu1 }
 0x295   : > { %v1370_v31 = vpop.f32.mrf.mxu2 }
 0x296   : > { %v1371_v32 = vadd.f32 %v1370_v31, %v1239_v6 }
 0x298   : > { %v1411_v33 = vsel %vm1240_vm9, %v1371_v32, -inf }
 0x299   : > { %1412 = vmax.xlane.f32.xlu2 %v1411_v33 }
 0x29d   : > { %v1372_v35 = vpop.f32.mrf.mxu2  ;;  %v1389_v36 = vpop.f32.mrf.mxu3 }
 0x29e   : > { %v1390_v37 = vadd.f32 %v1389_v36, %v1239_v6 }
 0x2a0   : > { %v1414_v39 = vsel %vm1240_vm9, %v1390_v37, -inf }
 0x2a1   : > { %1409 = vmax.xlane.f32.xlu2 %v1408_v38  ;;  %1415 = vmax.xlane.f32.xlu0 %v1414_v39 }
 0x2a5   : > { %v1391_v40 = vpop.f32.mrf.mxu3 }
 0x2d6   : > { %v1395_v41 = vpop.xlane.xlu0 %1394 }
 0x2d7   : > { %v1417_v42 = vsub.f32 %v1257_v9, %v1395_v41 }
 0x2d9   : > { %v1425_v43 = vmul.f32 1.442695, %v1417_v42 }
 0x2db   : > { %2552 = vpow2.f32 %v1425_v43 }
 0x2de   : > { %v1398_v46 = vpop.xlane.xlu1 %1397 }
 0x2df   : > { %v1418_v49 = vsub.f32 %v1276_v13, %v1398_v46 }
 0x2e1   : > { %v2553_v44 = vpop.eup %2552  ;;  %v1427_v51 = vmul.f32 1.442695, %v1418_v49 }
 0x2e2   : > { %v1441_v45 = vsel %vm1240_vm9, %v2553_v44, 0.0 }
 0x2e3   : > { %1442 = vadd.xlane.f32.xlu2 %v1441_v45 }
 0x2e6   : > { %v1401_v47 = vpop.xlane.xlu2 %1400 }
 0x2e7   : > { %v1419_v48 = vsub.f32 %v1295_v18, %v1401_v47 }
 0x2e9   : > { %v1429_v50 = vmul.f32 1.442695, %v1419_v48 }
 0x2eb   : > { %2554 = vpow2.f32 %v1429_v50 }
 0x2ec   : > { %2556 = vpow2.f32 %v1427_v51 }
 0x2ef   : > { %v1404_v52 = vpop.xlane.xlu2 %1403 }
 0x2f0   : > { %v1420_v53 = vsub.f32 %v1314_v22, %v1404_v52  ;;  %v1407_v54 = vpop.xlane.xlu1 %1406  ;;  %v1643_v52 = vld [vmem:[%s2784_s29] sm:$0xf] }
 0x2f1   : > { %v2555_v55 = vpop.eup %2554  ;;  %v1421_v57 = vsub.f32 %v1333_v24, %v1407_v54  ;;  %v2402_v54 = vld [vmem:[%s2784_s29 + $0x4] sm:$0xf] }
 0x2f2   : > { %v1431_v56 = vmul.f32 1.442695, %v1420_v53  ;;  %v1447_v58 = vsel %vm1240_vm9, %v2555_v55, 0.0  ;;  %v2557_v60 = vpop.eup %2556  ;;  %v1671_v53 = vsel %vm1492_vm10, %v1643_v52, 0 }
 0x2f3   : > { %1448 = vadd.xlane.f32.xlu0 %v1447_v58  ;;  %v1433_v59 = vmul.f32 1.442695, %v1421_v57  ;;  %v1444_v63 = vsel %vm1240_vm9, %v2557_v60, 0.0 }
 0x2f4   : > { %2558 = vpow2.f32 %v1431_v56 }
 0x2f5   : > { %2560 = vpow2.f32 %v1433_v59 }
 0x2fa   : > { %v2559_v61 = vpop.eup %2558 }
 0x2fb   : > { %v1450_v62 = vsel %vm1240_vm9, %v2559_v61, 0.0  ;;  %1445 = vadd.xlane.f32.xlu0 %v1444_v63  ;;  %v2561_v0 = vpop.eup %2560 }
 0x2fc   : > { %1451 = vadd.xlane.f32.xlu1 %v1450_v62  ;;  %v1453_v1 = vsel %vm1240_vm9, %v2561_v0, 0.0 }
 0x303   : > { %1454 = vadd.xlane.f32.xlu0 %v1453_v1 }
 0x30c   : > { %v1413_v2 = vpop.xlane.xlu2 %1412 }
 0x30d   : > { %v1423_v3 = vsub.f32 %v1371_v32, %v1413_v2  ;;  %v2407_v2 = vld [vmem:[%s2784_s29 + $0xc] sm:$0xf] }
 0x30f   : > { %v1437_v4 = vmul.f32 1.442695, %v1423_v3 }
 0x311   : > { %2562 = vpow2.f32 %v1437_v4  ;;  %v1719_v4 = vsel %vm1492_vm10, %v2407_v2, 0 }
 0x314   : > { %v1410_v6 = vpop.xlane.xlu2 %1409  ;;  %v1416_v8 = vpop.xlane.xlu0 %1415 }
 0x315   : > { %v1422_v9 = vsub.f32 %v1352_v34, %v1410_v6  ;;  %v1424_v10 = vsub.f32 %v1390_v37, %v1416_v8 }
 0x317   : > { %v2563_v11 = vpop.eup %2562  ;;  %v1435_v12 = vmul.f32 1.442695, %v1422_v9  ;;  %v1439_v13 = vmul.f32 1.442695, %v1424_v10 }
 0x318   : > { %v1459_v14 = vsel %vm1240_vm9, %v2563_v11, 0.0 }
 0x319   : > { %2564 = vpow2.f32 %v1435_v12  ;;  %1460 = vadd.xlane.f32.xlu1 %v1459_v14 }
 0x31a   : > { %2566 = vpow2.f32 %v1439_v13 }
 0x31f   : > { %v2565_v16 = vpop.eup %2564 }
 0x320   : > { %v2567_v17 = vpop.eup %2566  ;;  %v1456_v18 = vsel %vm1240_vm9, %v2565_v16, 0.0 }
 0x321   : > { %1457 = vadd.xlane.f32.xlu1 %v1456_v18  ;;  %v1462_v19 = vsel %vm1240_vm9, %v2567_v17, 0.0 }
 0x322   : > { %1463 = vadd.xlane.f32.xlu2 %v1462_v19 }
 0x356   : > { %v1443_v20 = vpop.xlane.xlu2 %1442 }
 0x357   : > { %2568 = vrcp.f32 %v1443_v20 }
 0x35d   : > { %v2569_v21 = vpop.eup %2568 }
 0x35e   : > { %v1473_v22 = vmul.f32 %v2569_v21, %v2553_v44 }
 0x360   : > { %v1481_v23 = vpack.c.bf16 %v1473_v22, %v1473_v22 }
 0x362   : > { %2394 = vmatmul.msk.bf16.vlgmr.msrb.gmra.mxu0 %vm1240_vm9, %v1481_v23 }
 0x366   : > { %v1449_v24 = vpop.xlane.xlu0 %1448 }
 0x367   : > { %2570 = vrcp.f32 %v1449_v24  ;;  %v2541_v24 = vld [vmem:[%s3110_s2] ss:$0 sm:$0xff]  ;;  %s3113_s2 = sld [smem:[#allocation17_spill]] (!%p2452_p5) }
 0x36d   : > { %v2571_v25 = vpop.eup %2570 }
 0x36e   : > { %v1475_v26 = vmul.f32 %v2571_v25, %v2555_v55  ;;  %v1446_v28 = vpop.xlane.xlu0 %1445  ;;  %v1651_v55 = vsel %vm1492_vm10, %v2402_v54, 0 }
 0x36f   : > { %v1452_v27 = vpop.xlane.xlu1 %1451  ;;  %1660 = vmatpush.bf16.msrb.mxu0 %v1651_v55 }
 0x370   : > { %2572 = vrcp.f32 %v1452_v27  ;;  %v1483_v29 = vpack.c.bf16 %v1475_v26, %v1475_v26 }
 0x371   : > { %2574 = vrcp.f32 %v1446_v28 }
 0x372   : > { %2396 = vmatmul.msk.bf16.vlgmr.msra.gmra.mxu2 %vm1240_vm9, %v1483_v29 }
 0x376   : > { %v2573_v30 = vpop.eup %2572  ;;  %v1455_v33 = vpop.xlane.xlu0 %1454 }
 0x377   : > { %v2575_v31 = vpop.eup %2574  ;;  %v1476_v32 = vmul.f32 %v2573_v30, %v2559_v61  ;;  %2576 = vrcp.f32 %v1455_v33  ;;  %v2405_v61 = vld [vmem:[%s2784_s29 + $0x8] sm:$0xf] }
 0x378   : > { %v1474_v34 = vmul.f32 %v2575_v31, %v2557_v60 }
 0x379   : > { %v1484_v35 = vpack.c.bf16 %v1476_v32, %v1476_v32 }
 0x37a   : > { %v1482_v36 = vpack.c.bf16 %v1474_v34, %v1474_v34 }
 0x37b   : > { %2397 = vmatmul.msk.bf16.vlgmr.msrb.gmra.mxu3 %vm1240_vm9, %v1484_v35 }
 0x37c   : > { %2395 = vmatmul.msk.bf16.vlgmr.msra.gmra.mxu1 %vm1240_vm9, %v1482_v36  ;;  %1728 = vmatpush.bf16.msrb.mxu3 %v1719_v4  ;;  %v2542_v4 = vld [vmem:[%s702_s27] ss:$0 sm:$0xff] }
 0x37d   : > { %v2577_v37 = vpop.eup %2576  ;;  %1680 = vmatpush.bf16.msra.mxu1 %v1671_v53 }
 0x37e   : > { %v1477_v38 = vmul.f32 %v2577_v37, %v2561_v0  ;;  %v1694_v0 = vsel %vm1492_vm10, %v2405_v61, 0 }
 0x37f   : > { %1703 = vmatpush.bf16.msra.mxu2 %v1694_v0 }
 0x380   : > { %v1485_v39 = vpack.c.bf16 %v1477_v38, %v1477_v38 }
 0x382   : > { %2398 = vmatmul.msk.bf16.vlgmr.msra.gmra.mxu0 %vm1240_vm9, %v1485_v39 }
 0x38c   : > { %v1461_v40 = vpop.xlane.xlu1 %1460 }
 0x38d   : > { %2578 = vrcp.f32 %v1461_v40 }
 0x393   : > { %v2579_v41 = vpop.eup %2578 }
 0x394   : > { %v1479_v42 = vmul.f32 %v2579_v41, %v2563_v11  ;;  %v1458_v43 = vpop.xlane.xlu1 %1457 }
 0x395   : > { %2580 = vrcp.f32 %v1458_v43  ;;  %v1464_v44 = vpop.xlane.xlu2 %1463 }
 0x396   : > { %v1487_v45 = vpack.c.bf16 %v1479_v42, %v1479_v42  ;;  %2582 = vrcp.f32 %v1464_v44 }
 0x398   : > { %2400 = vmatmul.msk.bf16.vlgmr.msrb.gmra.mxu2 %vm1240_vm9, %v1487_v45 }
 0x39b   : > { %v2581_v46 = vpop.eup %2580 }
 0x39c   : > { %v2583_v47 = vpop.eup %2582  ;;  %v1478_v48 = vmul.f32 %v2581_v46, %v2565_v16 }
 0x39d   : > { %v1480_v49 = vmul.f32 %v2583_v47, %v2567_v17 }
 0x39e   : > { %v1486_v50 = vpack.c.bf16 %v1478_v48, %v1478_v48  ;;  %v2496_v48 = vld [vmem:[%s2811_s1 + $0x8] sm:$0xff] }
 0x39f   : > { %v1488_v51 = vpack.c.bf16 %v1480_v49, %v1480_v49  ;;  %1831 = vmatpush.bf16.msra.mxu0 %v2496_v48 }
 0x3a0   : > { %2399 = vmatmul.msk.bf16.vlgmr.msrb.gmra.mxu1 %vm1240_vm9, %v1486_v50 }
 0x3a1   : > { %2401 = vmatmul.msk.bf16.vlgmr.msra.gmra.mxu3 %vm1240_vm9, %v1488_v51  ;;  %v2495_v51 = vld [vmem:[%s2811_s1] sm:$0xff] }
 0x3a3   : > { %1832 = vmatpush.bf16.msra.mxu0 %v2495_v51 }
 0x3df   : > { %v1505_v56 = vpop.f32.mrf.mxu0 }
 0x3e7   : > { %v1507_v57 = vpop.f32.mrf.mxu0 }
 0x3f5   : > { %v1543_v58 = vpop.f32.mrf.mxu2 }
 0x3f9   : > { %v1524_v59 = vpop.f32.mrf.mxu1 }
 0x3fa   : > { %v1642_v60 = vpack.c.bf16 %v1524_v59, %v1505_v56 }
 0x3fc   : > { %2404 = vmatmul.msk.bf16.vlgmr.msra.gmra.mxu1 %vm1240_vm9, %v1642_v60 }
 0x3fd   : > { %v1545_v62 = vpop.f32.mrf.mxu2 }
 0x3fe   : > { %v1562_v63 = vpop.f32.mrf.mxu3 }
 0x3ff   : > { %v1644_v1 = vpack.c.bf16 %v1562_v63, %v1543_v58  ;;  %v1581_v3 = vpop.f32.mrf.mxu0 }
 0x401   : > { %v1526_v6 = vpop.f32.mrf.mxu1  ;;  %2403 = vmatmul.msk.bf16.vlgmr.msrb.gmra.mxu0 %vm1240_vm9, %v1644_v1 }
 0x406   : > { %v1564_v8 = vpop.f32.mrf.mxu3 }
 0x407   : > { %v1583_v9 = vpop.f32.mrf.mxu0 }
 0x41b   : > { %v1619_v10 = vpop.f32.mrf.mxu2 }
 0x41d   : > { %v1600_v11 = vpop.f32.mrf.mxu1 }
 0x41e   : > { %v1687_v12 = vpack.c.bf16 %v1600_v11, %v1581_v3 }
 0x420   : > { %2406 = vmatmul.msk.bf16.vlgmr.msra.gmra.mxu2 %vm1240_vm9, %v1687_v12 }
 0x423   : > { %v1621_v13 = vpop.f32.mrf.mxu2 }
 0x424   : > { %v1638_v14 = vpop.f32.mrf.mxu3 }
 0x425   : > { %v1712_v16 = vpack.c.bf16 %v1638_v14, %v1619_v10  ;;  %v1602_v17 = vpop.f32.mrf.mxu1  ;;  %v2543_v10 = vld [vmem:[%s705_s17] ss:$0 sm:$0xff] }
 0x427   : > { %2408 = vmatmul.msk.bf16.vlgmr.msrb.gmra.mxu3 %vm1240_vm9, %v1712_v16 }
 0x42c   : > { %v1640_v18 = vpop.f32.mrf.mxu3 }
 0x42d   : > { %v2504_v18 = vld [vmem:[%s2821_s6 + $0x38] sm:$0xff] }
 0x42e   : > { %1950 = vmatpush.bf16.msrb.mxu1 %v2504_v18 }
 0x479   : > { %v1682_v20 = vpop.f32.mrf.mxu1 }
 0x47e   : > { %v1662_v19 = vpop.f32.mrf.mxu0 }
 0x47f   : > { %v1683_v22 = vadd.f32 %v1682_v20, %v1662_v19  ;;  %v2503_v19 = vld [vmem:[%s2821_s6 + $0x30] sm:$0xff]  ;;  %v2502_v20 = vld [vmem:[%s2821_s6 + $0x28] sm:$0xff] }
 0x480   : > { %1951 = vmatpush.bf16.msrb.mxu1 %v2503_v19 }
 0x481   : > { %v1684_v29 = vpop.f32.mrf.mxu1 }
 0x484   : > { %1952 = vmatpush.bf16.msrb.mxu1 %v2502_v20 }
 0x486   : > { %v1664_v27 = vpop.f32.mrf.mxu0 }
 0x487   : > { %v1685_v31 = vadd.f32 %v1684_v29, %v1664_v27 }
 0x4a3   : > { %v1705_v21 = vpop.f32.mrf.mxu2 }
 0x4a4   : > { %v1710_v23 = vadd.f32 %v1705_v21, %v1683_v22  ;;  %v2501_v21 = vld [vmem:[%s2821_s6 + $0x20] sm:$0xff]  ;;  %v2500_v22 = vld [vmem:[%s2821_s6 + $0x18] sm:$0xff] }
 0x4a5   : > { %1953 = vmatpush.bf16.msrb.mxu1 %v2501_v21 }
 0x4a9   : > { %1954 = vmatpush.bf16.msrb.mxu1 %v2500_v22 }
 0x4aa   : > { %v1730_v25 = vpop.f32.mrf.mxu3 }
 0x4ab   : > { %v1735_v26 = vadd.f32 %v1730_v25, %v1710_v23  ;;  %v1707_v30 = vpop.f32.mrf.mxu2  ;;  %v2544_v23 = vld [vmem:[%s713_s5] ss:$0 sm:$0xff]  ;;  %v2499_v25 = vld [vmem:[%s2821_s6 + $0x10] sm:$0xff] }
 0x4ac   : > { %v1711_v33 = vadd.f32 %v1707_v30, %v1685_v31  ;;  %v2497_v31 = vld [vmem:[%s2821_s6] sm:$0xff] }
 0x4ad   : > { %v1741_v28 = vadd.f32 %v2541_v24, %v1735_v26  ;;  %1955 = vmatpush.bf16.msrb.mxu1 %v2499_v25 }
 0x4af   : > { %v2989_v32 = vadd.f32 %v1741_v28, %v2837_v5  ;;  %v2498_v28 = vld [vmem:[%s2821_s6 + $0x8] sm:$0xff] }
 0x4b1   : > { %v1747_v34 = vsel %vm739_vm1, %v2989_v32, 0.0  ;;  %1956 = vmatpush.bf16.msrb.mxu1 %v2498_v28 }
 0x4b2   : > { %v1732_v35 = vpop.f32.mrf.mxu3  ;;  %1748 = vadd.xlane.f32.xlu2 %v1747_v34 }
 0x4b3   : > { %v1736_v36 = vadd.f32 %v1732_v35, %v1711_v33 }
 0x4b5   : > { %v1742_v37 = vadd.f32 %v2541_v24, %v1736_v36  ;;  %1957 = vmatpush.bf16.msrb.mxu1 %v2497_v31 }
 0x4b7   : > { %v2994_v38 = vadd.f32 %v1742_v37, %v2841_v7 }
 0x4b9   : > { %v1750_v39 = vsel %vm739_vm1, %v2994_v38, 0.0 }
 0x4ba   : > { %1751 = vadd.xlane.f32.xlu0 %v1750_v39 }
 0x525   : > { %v1749_v40 = vpop.xlane.xlu2 %1748 }
 0x526   : > { %v1753_v5 = vmul.f32 %v1749_v40, %v2845_v15 }
 0x528   : > { %v1755_v41 = vsub.f32 %v2989_v32, %v1753_v5 }
 0x52a   : > { %v1757_v42 = vmul.f32 %v1755_v41, %v1755_v41 }
 0x52c   : > { %v1759_v43 = vsel %vm739_vm1, %v1757_v42, 0.0 }
 0x52d   : > { %1760 = vadd.xlane.f32.xlu1 %v1759_v43  ;;  %v1752_v44 = vpop.xlane.xlu0 %1751 }
 0x52e   : > { %v1754_v45 = vmul.f32 %v1752_v44, %v2845_v15 }
 0x530   : > { %v1756_v7 = vsub.f32 %v2994_v38, %v1754_v45 }
 0x532   : > { %v1758_v46 = vmul.f32 %v1756_v7, %v1756_v7 }
 0x534   : > { %v1762_v47 = vsel %vm739_vm1, %v1758_v46, 0.0 }
 0x535   : > { %1763 = vadd.xlane.f32.xlu2 %v1762_v47 }
 0x5a0   : > { %v1761_v49 = vpop.xlane.xlu1 %1760 }
 0x5a1   : > { %v1765_v50 = vmul.f32 %v1761_v49, %v2845_v15 }
 0x5a3   : > { %v1767_v52 = vadd.f32 1e-05, %v1765_v50 }
 0x5a5   : > { %2584 = vrsqrt.f32 %v1767_v52  ;;  %vm1775_vm13 = vweird.f32 %v1767_v52 }
 0x5a8   : > { %v1764_v53 = vpop.xlane.xlu2 %1763 }
 0x5a9   : > { %v1766_v54 = vmul.f32 %v1764_v53, %v2845_v15 }
 0x5ab   : > { %v2585_v55 = vpop.eup %2584  ;;  %v1768_v56 = vadd.f32 1e-05, %v1766_v54 }
 0x5ac   : > { %v1770_v57 = vmul.f32 %v2585_v55, %v1767_v52  ;;  %vm1776_vm12 = vweird.f32 %v2585_v55 }
 0x5ad   : > { %2586 = vrsqrt.f32 %v1768_v56  ;;  %vm1777_vm14 = vmor %vm1775_vm13, %vm1776_vm12  ;;  %vm1785_vm0 = vweird.f32 %v1768_v56 }
 0x5ae   : > { %v1771_v58 = vmul.f32 %v2585_v55, %v1770_v57 }
 0x5b0   : > { %v1772_v59 = vmul.f32 0.5, %v1771_v58 }
 0x5b2   : > { %v1773_v60 = vsub.f32 1.5, %v1772_v59 }
 0x5b3   : > { %v2587_v61 = vpop.eup %2586 }
 0x5b4   : > { %v1774_v62 = vmul.f32 %v2585_v55, %v1773_v60  ;;  %v1780_v63 = vmul.f32 %v2587_v61, %v1768_v56  ;;  %vm1786_vm15 = vweird.f32 %v2587_v61 }
 0x5b5   : > { %vm1787_vm2 = vmor %vm1785_vm0, %vm1786_vm15 }
 0x5b6   : > { %v1781_v0 = vmul.f32 %v2587_v61, %v1780_v63  ;;  %v1778_v1 = vsel %vm1777_vm14, %v2585_v55, %v1774_v62  ;;  %v2545_v62 = vld [vmem:[%s721_s7] ss:$0 sm:$0xff] }
 0x5b7   : > { %v1789_v6 = vmul.f32 %v1778_v1, %v1755_v41 }
 0x5b8   : > { %v1782_v2 = vmul.f32 0.5, %v1781_v0 }
 0x5b9   : > { %v1794_v11 = vmul.f32 %v2542_v4, %v1789_v6 }
 0x5ba   : > { %v1783_v3 = vsub.f32 1.5, %v1782_v2 }
 0x5bb   : > { %v1799_v14 = vadd.f32 %v2543_v10, %v1794_v11 }
 0x5bc   : > { %v1784_v8 = vmul.f32 %v2587_v61, %v1783_v3 }
 0x5be   : > { %v1788_v9 = vsel %vm1787_vm2, %v2587_v61, %v1784_v8 }
 0x5bf   : > { %v1790_v12 = vmul.f32 %v1788_v9, %v1756_v7 }
 0x5c1   : > { %v1795_v13 = vmul.f32 %v2542_v4, %v1790_v12 }
 0x5c3   : > { %v1800_v16 = vadd.f32 %v2543_v10, %v1795_v13 }
 0x5c5   : > { %v1801_v17 = vpack.c.bf16 %v1800_v16, %v1799_v14 }
 0x5c7   : > { %2417 = vmatmul.msk.bf16.vlgmr.msra.gmra.mxu0 %vm739_vm1, %v1801_v17 }
 0x644   : > { %v1834_v24 = vpop.f32.mrf.mxu0 }
 0x645   : > { %v1835_v26 = vadd.f32 %v2544_v23, %v1834_v24 }
 0x647   : > { %v2418_v27 = vmul.f32 -1.702, %v1835_v26 }
 0x649   : > { %v1843_v29 = vmul.f32 1.442695, %v2418_v27 }
 0x64b   : > { %2588 = vpow2.f32 %v1843_v29 }
 0x64c   : > { %v1836_v30 = vpop.f32.mrf.mxu0 }
 0x64d   : > { %v1837_v33 = vadd.f32 %v2544_v23, %v1836_v30 }
 0x64f   : > { %v2419_v34 = vmul.f32 -1.702, %v1837_v33 }
 0x651   : > { %v2589_v35 = vpop.eup %2588  ;;  %v1845_v36 = vmul.f32 1.442695, %v2419_v34 }
 0x652   : > { %v1847_v37 = vadd.f32 1.0, %v2589_v35 }
 0x653   : > { %2590 = vpow2.f32 %v1845_v36 }
 0x654   : > { %2592 = vrcp.f32 %v1847_v37  ;;  %v1860_v46 = vand.u32 2147483648, %v1847_v37  ;;  %vm1854_vm4 = vweird.f32 %v1847_v37  ;;  %v1858_v47 = vand.u32 2147483647, %v1847_v37 }
 0x656   : > { %v1861_v53 = vor.u32 1.1754944e-38, %v1860_v46  ;;  %vm1859_vm7 = vcmp.eq.f32.partialorder %v1858_v47, 8.507059e+37 }
 0x659   : > { %v2591_v39 = vpop.eup %2590 }
 0x65a   : > { %v2593_v40 = vpop.eup %2592  ;;  %v1848_v5 = vadd.f32 1.0, %v2591_v39 }
 0x65b   : > { %v1850_v41 = vmul.f32 %v2593_v40, %v1847_v37  ;;  %vm1855_vm3 = vweird.f32 %v2593_v40 }
 0x65c   : > { %2594 = vrcp.f32 %v1848_v5  ;;  %vm1856_vm5 = vmor %vm1854_vm4, %vm1855_vm3  ;;  %v1875_v49 = vand.u32 2147483648, %v1848_v5  ;;  %v1873_v52 = vand.u32 2147483647, %v1848_v5  ;;  %vm1869_vm8 = vweird.f32 %v1848_v5 }
 0x65d   : > { %v1851_v42 = vsub.f32 1.0, %v1850_v41 }
 0x65e   : > { %v1876_v56 = vor.u32 1.1754944e-38, %v1875_v49  ;;  %vm1874_vm10 = vcmp.eq.f32.partialorder %v1873_v52, 8.507059e+37 }
 0x65f   : > { %v1852_v43 = vmul.f32 %v2593_v40, %v1851_v42 }
 0x661   : > { %v1853_v45 = vadd.f32 %v2593_v40, %v1852_v43 }
 0x662   : > { %v2595_v44 = vpop.eup %2594 }
 0x663   : > { %v1865_v7 = vmul.f32 %v2595_v44, %v1848_v5  ;;  %v1857_v50 = vsel %vm1856_vm5, %v2593_v40, %v1853_v45  ;;  %vm1870_vm6 = vweird.f32 %v2595_v44 }
 0x664   : > { %v1862_v55 = vsel %vm1859_vm7, %v1861_v53, %v1857_v50  ;;  %vm1871_vm9 = vmor %vm1869_vm8, %vm1870_vm6 }
 0x665   : > { %v1866_v48 = vsub.f32 1.0, %v1865_v7  ;;  %v1879_v59 = vmul.f32 %v1862_v55, %v1835_v26 }
 0x667   : > { %v1867_v51 = vmul.f32 %v2595_v44, %v1866_v48 }
 0x669   : > { %v1868_v54 = vadd.f32 %v2595_v44, %v1867_v51 }
 0x66b   : > { %v1872_v57 = vsel %vm1871_vm9, %v2595_v44, %v1868_v54 }
 0x66c   : > { %v1877_v58 = vsel %vm1874_vm10, %v1876_v56, %v1872_v57 }
 0x66d   : > { %v1880_v60 = vmul.f32 %v1877_v58, %v1837_v33 }
 0x66f   : > { %v1881_v61 = vpack.c.bf16 %v1880_v60, %v1879_v59 }
 0x671   : > { %1958 = vmatmul.bf16.vlgmr.msrb.gmra.mxu1 %v1881_v61 }
 0x6ee   : > { %v1959_v63 = vpop.f32.mrf.mxu1 }
 0x6ef   : > { %v1960_v0 = vadd.f32 %v2545_v62, %v1959_v63 }
 0x6f1   : > { %v1964_v1 = vadd.f32 %v1960_v0, %v2989_v32 }
 0x6f3   : > { %1966 = vst.msk [vmem:[#allocation2] sm:$0xff] %vm739_vm1, %v1964_v1 }
 0x6f6   : > { %v1961_v2 = vpop.f32.mrf.mxu1 }
 0x6f7   : > { %v1962_v3 = vadd.f32 %v2545_v62, %v1961_v2  ;;  %1971 = sbr.rel (%p2452_p5) target bundleno = 2202 (0x89a), region = 96 }
 0x6f9   : > { %v1965_v4 = vadd.f32 %v1962_v3, %v2994_v38 }
 0x6fb   : > { %1967 = vst.msk [vmem:[#allocation2 + $0x8] sm:$0xff] %vm739_vm1, %v1965_v4 }
 0x6fc   : > { %vm1982_vm11 = vcmask 1040384   ;;  %vm1986_vm12 = vcmask 254976   ;;  %v2506_v16 = vld [vmem:[%s3112_s23 + $0x8] sm:$0xff]  ;;  %v2505_v17 = vld [vmem:[%s3112_s23] sm:$0xff] }
 0x6fd   : > { %2043 = vmatpush.bf16.msra.mxu0 %v2506_v16  ;;  %v2596_v27 = vld [vmem:[%s3113_s2] ss:$0 sm:$0xff] }
 0x701   : > { %2044 = vmatpush.bf16.msra.mxu0 %v2505_v17 }
 0x702   : > { %v1974_v6 = vld [vmem:[%s1973_s22] sm:$0x1]  ;;  %v2454_v8 = vld [vmem:[%s2128_s12 + $0x8] sm:$0x1] }
 0x703   : > { %v1980_v9 = vrot.slane %v2454_v8, 7 }
 0x705   : > { %v1983_v32 = vsel %vm1982_vm11, %v1974_v6, %v1980_v9 }
 0x706   : > { %v1987_v10 = vsel %vm1986_vm12, %v1983_v32, 0.0 }
 0x707   : > { %1988 = vadd.xlane.f32.xlu0 %v1987_v10 }
 0x77a   : > { %v1989_v11 = vpop.xlane.xlu0 %1988 }
 0x77b   : > { %v1990_v38 = vmul.f32 %v1989_v11, %v2845_v15 }
 0x77d   : > { %v1991_v12 = vsub.f32 %v1983_v32, %v1990_v38 }
 0x77f   : > { %v1992_v13 = vmul.f32 %v1991_v12, %v1991_v12 }
 0x781   : > { %v1993_v14 = vsel %vm1986_vm12, %v1992_v13, 0.0 }
 0x782   : > { %1994 = vadd.xlane.f32.xlu0 %v1993_v14 }
 0x7f5   : > { %v1995_v18 = vpop.xlane.xlu0 %1994 }
 0x7f6   : > { %v1996_v19 = vmul.f32 %v1995_v18, %v2845_v15  ;;  %v2597_v15 = vld [vmem:[%s3114_s18] ss:$0 sm:$0xff] }
 0x7f8   : > { %v1997_v20 = vadd.f32 1e-05, %v1996_v19 }
 0x7fa   : > { %2598 = vrsqrt.f32 %v1997_v20  ;;  %vm2004_vm14 = vweird.f32 %v1997_v20 }
 0x800   : > { %v2599_v21 = vpop.eup %2598 }
 0x801   : > { %v1999_v22 = vmul.f32 %v2599_v21, %v1997_v20  ;;  %vm2005_vm13 = vweird.f32 %v2599_v21 }
 0x802   : > { %vm2006_vm15 = vmor %vm2004_vm14, %vm2005_vm13 }
 0x803   : > { %v2000_v23 = vmul.f32 %v2599_v21, %v1999_v22 }
 0x805   : > { %v2001_v24 = vmul.f32 0.5, %v2000_v23 }
 0x807   : > { %v2002_v25 = vsub.f32 1.5, %v2001_v24 }
 0x809   : > { %v2003_v26 = vmul.f32 %v2599_v21, %v2002_v25 }
 0x80b   : > { %v2007_v28 = vsel %vm2006_vm15, %v2599_v21, %v2003_v26 }
 0x80c   : > { %v2008_v29 = vmul.f32 %v2007_v28, %v1991_v12 }
 0x80e   : > { %v2012_v30 = vmul.f32 %v2596_v27, %v2008_v29 }
 0x810   : > { %v2016_v31 = vadd.f32 %v2597_v15, %v2012_v30 }
 0x812   : > { %v2017_v33 = vpack.c.bf16 %v2016_v31, %v2016_v31 }
 0x814   : > { %2463 = vmatmul.msk.bf16.vlgmr.msra.gmra.mxu0 %vm739_vm1, %v2017_v33 }
 0x891   : > { %v2046_v34 = vpop.f32.mrf.mxu0 }
 0x892   : > { %2050 = vst.msk [vmem:[#allocation5] sm:$0x3] %vm1986_vm12, %v2046_v34 }
 0x899   : > { %v2048_v35 = vpop.f32.mrf.mxu0 }
 0x89a PF: > { %p2513_p6 = scmp.eq.s32.totalorder %s2762_s19, 1  ;;  %s2657_s21 = smov [#allocation5]  }
 0x89b   : > { %s2057_s17 = sshll.u32 %s2657_s21, 4  ;;  %s3115_s5 = sld [smem:[#allocation20_spill]]  ;;  %s2058_s17 = int_to_ptr.vmem [resolvable:$true] %s2057_s17 }
 0x8a1   : > { %s2059_s6 = sshll.u32 %s3115_s5, 4  ;;  %s2060_s6 = int_to_ptr.hbm [resolvable:$true] %s2059_s6 }
 0x8a2   : > { %2510 = dma.vmem_to_hbm [thread:$0]  (%p2513_p6), %s2058_s17, 32, %s2060_s6, [#allocation6]  }
 0x8a3   : > { %2647 = dma.done.wait (%p2513_p6), [#allocation6], 32  }
 0x8a4   : > { %2649 = vsyncadd (%p2513_p6), [#allocation6], 4294967264 }
 0x8a5 PF: > { %s3116_s26 = sld [smem:[#allocation9_spill]] }
 0x8ab   : > { %s37_s0 = sadd.s32 1, %s3116_s26  }
 0x8ac   : > { %p34_p7 = scmp.ge.s32.totalorder %s37_s0, 4  }
 0x8ae   :  { %36 = sbr.rel (!%p34_p7) target bundleno = 24 (0x18), region = 174 }
 0x8b3   :  { %2073 = vsyncpa [#allocation6], 1 }
 0x8b4   :  { %2075 = vsyncpa [#allocation6 + $0x1], 1 }

</bundles_post_ra>
